<compile_context>
chip_gen: v7x
topology: tpu7x:2x2x1
jax: 0.10.0
libtpu: 0.0.40
codegen_flags: <defaults>
</compile_context>

<pallas_src>
import functools
import math

import jax
import jax.numpy as jnp
from jax.experimental import pallas as pl
from jax.experimental.pallas import tpu as pltpu


# -----------------------------------------------------------------------------
# helpers
# -----------------------------------------------------------------------------
def _round_up(x, m):
    return ((x + m - 1) // m) * m


def _pad_axis(x, axis, size):
    pad = size - x.shape[axis]
    if pad <= 0:
        return x
    widths = [(0, 0)] * x.ndim
    widths[axis] = (0, pad)
    return jnp.pad(x, widths)


def _pad_gate_cols(w, d, d_pad):
    """(..., 4*d) -> (..., 4*d_pad): pad each of the i/f/g/o blocks separately."""
    lead = w.shape[:-1]
    w = w.reshape(lead + (4, d))
    w = jnp.pad(w, [(0, 0)] * len(lead) + [(0, 0), (0, d_pad - d)])
    return w.reshape(lead + (4 * d_pad,))


def _compute_dtype():
    # bf16 only where it feeds the MXU on a real TPU; plain f32 elsewhere
    # (CPU XLA's DotThunk rejects bf16 x bf16 -> f32, which crashed rev 1).
    return jnp.bfloat16 if jax.default_backend() == "tpu" else jnp.float32


def _mxu_lane_multiple():
    # Perf review (v6e item): pad MXU N dims to 256 on v6e/v7x (2x256^2 MXUs);
    # 128 is already optimal on v5e (4x128^2) and is the safe default.
    try:
        kind = jax.devices()[0].device_kind.lower()
        if "v6" in kind or "v7" in kind:
            return 256
    except Exception:
        pass
    return 128


def _vmem_cap_bytes():
    # Leave headroom below physical VMEM (128 MiB v5e/v6e, 64 MiB/TC v7x).
    try:
        return int(pltpu.get_tpu_info().vmem_capacity_bytes * 3 // 4)
    except Exception:
        return 96 * 1024 * 1024


# -----------------------------------------------------------------------------
# Pallas kernel: one grid step == one decode time step for one batch block.
# grid = (num_batch_blocks [parallel], T [arbitrary / sequential recurrence])
# -----------------------------------------------------------------------------
def _decoder_step_kernel(
    gates_pre_ref,   # (1, Bt, 4*Dp)    cdt  emb@W_ih_emb + b_ih + b_hh (hoisted)
    attk_ref,        # (Bt, Pp, Ap)     cdt  K projection (precomputed)
    attv_ref,        # (Bt, Pp, Ep)     cdt  V projection (precomputed)
    h0_ref,          # (Bt, Dp)         f32  initial hidden state
    c0_ref,          # (Bt, Dp)         f32  initial cell state
    wfused_ref,      # (Dp, Ap+Ep+4Dp)  cdt  [Wq | Wbeta | Whh] fused
    bq_ref,          # (1, Ap)          f32
    bbeta_ref,       # (1, Ep)          f32
    wia_ref,         # (Ep, 4*Dp)       cdt  attention -> gates input weight
    pixmask_ref,     # (1, Pp)          f32  0 for real pixels, -1e30 for pad
    hseq_ref,        # out (1, Bt, Dp)  cdt  h_t sequence (vocab proj outside)
    alpha_ref,       # out (1, Bt, Pp)  f32  attention weights (lane-dense)
    h_scr,           # scratch (Bt, Dp) f32
    c_scr,           # scratch (Bt, Dp) f32
    *,
    att_dim,         # true attention dim (softmax scale)
    a_pad,           # padded attention dim (lane aligned)
    e_pad,           # padded encoder dim   (lane aligned)
):
    t = pl.program_id(1)
    cdt = attk_ref.dtype                     # MXU operand dtype (bf16 on TPU)
    d = h_scr.shape[1]                       # padded decoder dim

    # ---- state init once per batch block (h0/c0 precomputed in the wrapper) --
    @pl.when(t == 0)
    def _():
        h_scr[...] = h0_ref[...]
        c_scr[...] = c0_ref[...]

    h = h_scr[...]                           # (Bt, Dp) f32
    c = c_scr[...]                           # (Bt, Dp) f32

    # ---- ONE fused h-dependent matmul: [query | beta-logits | hh-gates] ------
    hz = jnp.dot(h.astype(cdt), wfused_ref[...],
                 preferred_element_type=jnp.float32)            # (Bt, Ap+Ep+4Dp)
    att_q = hz[:, :a_pad] + bq_ref[...]                          # (Bt, Ap)
    beta_logits = hz[:, a_pad:a_pad + e_pad] + bbeta_ref[...]    # (Bt, Ep)
    hh_gates = hz[:, a_pad + e_pad:]                             # (Bt, 4Dp)

    # ---- attention: both contractions on the MXU (flash-style, q-len 1) ------
    scores = jnp.einsum(
        "bqa,bpa->bqp", att_q[:, None, :].astype(cdt), attk_ref[...],
        preferred_element_type=jnp.float32)[:, 0, :]             # (Bt, Pp)
    scores = jnp.maximum(scores * (1.0 / math.sqrt(att_dim)), 0.0)   # scale+ReLU
    scores = scores + pixmask_ref[...]                 # mask padded pixels
    scores = scores - jnp.max(scores, axis=1, keepdims=True)    # stable softmax
    ex = jnp.exp(scores)
    alpha = ex * (1.0 / jnp.sum(ex, axis=1, keepdims=True))     # exact normalize
    att_out = jnp.einsum(
        "bqp,bpe->bqe", alpha[:, None, :].astype(cdt), attv_ref[...],
        preferred_element_type=jnp.float32)[:, 0, :]             # (Bt, Ep)

    # ---- f_beta gating --------------------------------------------------------
    attended = jax.nn.sigmoid(beta_logits) * att_out             # (Bt, Ep)

    # ---- LSTM cell (emb part of the gates precomputed & streamed) ------------
    gates = (gates_pre_ref[0].astype(jnp.float32)
             + jnp.dot(attended.astype(cdt), wia_ref[...],
                       preferred_element_type=jnp.float32)
             + hh_gates)                                         # (Bt, 4Dp)
    i_g = jax.nn.sigmoid(gates[:, 0 * d:1 * d])                  # lane-aligned
    f_g = jax.nn.sigmoid(gates[:, 1 * d:2 * d])
    g_g = jnp.tanh(gates[:, 2 * d:3 * d])
    o_g = jax.nn.sigmoid(gates[:, 3 * d:4 * d])
    c_new = f_g * c + i_g * g_g
    h_new = o_g * jnp.tanh(c_new)

    h_scr[...] = h_new
    c_scr[...] = c_new

    hseq_ref[0] = h_new.astype(hseq_ref.dtype)   # bf16 writeback on TPU
    alpha_ref[0] = alpha                         # lane-dense (Pp mult. of 128)


# -----------------------------------------------------------------------------
# Wrapper: sort, hoisted precompute, padding, pallas_call, fc + masking.
# -----------------------------------------------------------------------------
def decoder_lstm_forward(params, encoder_out, encoded_captions, caption_lens,
                         *, b_tile=8):
    cdt = _compute_dtype()
    lane = _mxu_lane_multiple()
    f32 = jnp.float32

    B = encoder_out.shape[0]
    E = encoder_out.shape[-1]
    enc = encoder_out.reshape(B, -1, E).astype(f32)               # (B, P, E)
    P = enc.shape[1]

    # ---- sort by descending caption length (as in the PyTorch module) -------
    lens = caption_lens[:, 0]
    sort_ind = jnp.argsort(-lens)
    lens_sorted = lens[sort_ind]
    enc = enc[sort_ind]
    caps_sorted = encoded_captions[sort_ind]
    decode_len = lens_sorted - 1

    max_len = encoded_captions.shape[1]
    T = max_len - 1            # static upper bound for max(decode_len)

    De = params["embedding"].shape[1]
    A = params["wq"].shape[1]
    D = params["whh"].shape[0]

    b_tile = max(8, b_tile)
    B_pad = _round_up(B, b_tile)
    nb = B_pad // b_tile
    P_pad = _round_up(P, 128)          # lane-dense alpha output
    A_pad = _round_up(A, lane)
    E_pad = _round_up(E, lane)
    D_pad = _round_up(D, lane)

    # ---- encoder-only / state-independent precompute (plain XLA, one-time) --
    att_k = jnp.einsum("bpe,ea->bpa", enc, params["wk"]) + params["bk"]  # (B,P,A)
    att_v = jnp.einsum("bpe,ef->bpf", enc, params["wv"]) + params["bv"]  # (B,P,E)
    mean = jnp.mean(enc, axis=1)                                          # (B,E)
    h0 = mean @ params["w_init_h"] + params["b_init_h"]                   # (B,D)
    c0 = mean @ params["w_init_c"] + params["b_init_c"]                   # (B,D)

    # embedding -> gate matmul hoisted out of the recurrence (streamed per step)
    emb = params["embedding"][caps_sorted][:, :T, :]                      # (B,T,De)
    gates_pre = (jnp.einsum("bte,eg->btg", emb, params["wih"][:De])
                 + params["bih"] + params["bhh"])                         # (B,T,4D)
    gates_pre = _pad_gate_cols(gates_pre, D, D_pad)                       # (B,T,4Dp)
    gates_pre = jnp.transpose(gates_pre, (1, 0, 2))                       # (T,B,4Dp)
    gates_pre = _pad_axis(gates_pre, 1, B_pad).astype(cdt)

    # K / V in natural (B, Pp, .) layout, MXU dtype (bf16 on TPU)
    att_k = _pad_axis(_pad_axis(_pad_axis(att_k, 2, A_pad), 1, P_pad),
                      0, B_pad).astype(cdt)
    att_v = _pad_axis(_pad_axis(_pad_axis(att_v, 2, E_pad), 1, P_pad),
                      0, B_pad).astype(cdt)
    h0 = _pad_axis(_pad_axis(h0, 1, D_pad), 0, B_pad).astype(f32)
    c0 = _pad_axis(_pad_axis(c0, 1, D_pad), 0, B_pad).astype(f32)

    # fused h-dependent weight: [Wq | Wbeta | Whh], all zero-padded
    wq = _pad_axis(_pad_axis(params["wq"], 1, A_pad), 0, D_pad)
    wbeta = _pad_axis(_pad_axis(params["wbeta"], 1, E_pad), 0, D_pad)
    whh = _pad_axis(_pad_gate_cols(params["whh"], D, D_pad), 0, D_pad)
    w_fused = jnp.concatenate([wq, wbeta, whh], axis=1).astype(cdt)  # (Dp,Ap+Ep+4Dp)
    wia = _pad_axis(_pad_gate_cols(params["wih"][De:], D, D_pad),
                    0, E_pad).astype(cdt)                             # (Ep, 4Dp)
    bq = _pad_axis(params["bq"], 1, A_pad).astype(f32)
    bbeta = _pad_axis(params["bbeta"], 1, E_pad).astype(f32)
    pixmask = jnp.where(jnp.arange(P_pad)[None, :] < P, 0.0, -1e30).astype(f32)

    # ---- BlockSpecs -----------------------------------------------------------
    on_tpu = jax.default_backend() == "tpu"

    def resident(shape, index_map):
        # (Nearly) grid-invariant inputs: single-buffer on TPU to halve VMEM.
        if on_tpu:
            return pl.BlockSpec(shape, index_map, pipeline_mode=pl.Buffered(1))
        return pl.BlockSpec(shape, index_map)

    Wcols = A_pad + E_pad + 4 * D_pad
    in_specs = [
        pl.BlockSpec((1, b_tile, 4 * D_pad), lambda b, t: (t, b, 0)),  # gates_pre
        resident((b_tile, P_pad, A_pad), lambda b, t: (b, 0, 0)),      # att_k
        resident((b_tile, P_pad, E_pad), lambda b, t: (b, 0, 0)),      # att_v
        resident((b_tile, D_pad), lambda b, t: (b, 0)),                # h0
        resident((b_tile, D_pad), lambda b, t: (b, 0)),                # c0
        resident((D_pad, Wcols), lambda b, t: (0, 0)),                 # w_fused
        resident((1, A_pad), lambda b, t: (0, 0)),                     # bq
        resident((1, E_pad), lambda b, t: (0, 0)),                     # bbeta
        resident((E_pad, 4 * D_pad), lambda b, t: (0, 0)),             # wia
        resident((1, P_pad), lambda b, t: (0, 0)),                     # pixmask
    ]
    out_specs = [
        pl.BlockSpec((1, b_tile, D_pad), lambda b, t: (t, b, 0)),      # h sequence
        pl.BlockSpec((1, b_tile, P_pad), lambda b, t: (t, b, 0)),      # alpha
    ]

    # ---- explicit VMEM budget (resident + double-buffered streams + scratch) -
    isz = jnp.dtype(cdt).itemsize
    resident_bytes = (b_tile * P_pad * A_pad * isz
                      + b_tile * P_pad * E_pad * isz
                      + D_pad * Wcols * isz
                      + E_pad * 4 * D_pad * isz
                      + 2 * b_tile * D_pad * 4
                      + (A_pad + E_pad + P_pad) * 4)
    streamed_bytes = 2 * (b_tile * 4 * D_pad * isz
                          + b_tile * D_pad * isz
                          + b_tile * P_pad * 4)
    scratch_bytes = 2 * b_tile * D_pad * 4
    vmem_limit = min(int(1.5 * (resident_bytes + streamed_bytes + scratch_bytes))
                     + (2 << 20), _vmem_cap_bytes())

    kernel = functools.partial(_decoder_step_kernel,
                               att_dim=A, a_pad=A_pad, e_pad=E_pad)

    hseq_tm, alpha_tm = pl.pallas_call(
        kernel,
        out_shape=(
            jax.ShapeDtypeStruct((T, B_pad, D_pad), cdt),
            jax.ShapeDtypeStruct((T, B_pad, P_pad), jnp.float32),
        ),
        grid_spec=pltpu.PrefetchScalarGridSpec(
            num_scalar_prefetch=0,
            grid=(nb, T),                       # batch blocks x time steps
            in_specs=in_specs,
            out_specs=out_specs,
            scratch_shapes=[
                pltpu.VMEM((b_tile, D_pad), jnp.float32),   # h carry
                pltpu.VMEM((b_tile, D_pad), jnp.float32),   # c carry
            ],
        ),
        compiler_params=pltpu.CompilerParams(
            dimension_semantics=("parallel", "arbitrary"),
            vmem_limit_bytes=vmem_limit),
    )(gates_pre, att_k, att_v, h0, c0, w_fused, bq, bbeta, wia, pixmask)

    # ---- vocab projection outside the recurrence (transpose fused) -----------
    # TODO(synk): dropout before fc is identity (eval-mode semantics).
    h_seq = hseq_tm[:, :B, :D]                                            # (T,B,D)
    preds = jnp.einsum("tbd,dv->btv", h_seq,
                       params["wfc"].astype(h_seq.dtype),
                       preferred_element_type=jnp.float32) + params["bfc"]  # (B,T,V)
    alphas = jnp.transpose(alpha_tm[:, :B, :P], (1, 0, 2))                # (B,T,P)

    # ---- length masking (replaces PyTorch's batch_size_i row slicing) --------
    tmask = jnp.arange(T)[None, :] < decode_len[:, None]                  # (B,T)
    predictions = jnp.where(tmask[:, :, None], preds, 0.0)
    alphas = jnp.where(tmask[:, :, None], alphas, 0.0)

    return predictions, alphas, caps_sorted, decode_len, sort_ind


# -----------------------------------------------------------------------------
# Deterministic parameter construction (weights pre-transposed for x @ W form)
# -----------------------------------------------------------------------------
def make_params(key, *, encoder_dim, decoder_dim, att_dim, embed_dim, vocab_size):
    def u(k, shape):
        return jax.random.uniform(k, shape, jnp.float32, -0.1, 0.1)

    ks = jax.random.split(key, 20)
    E, D, A, De, V = encoder_dim, decoder_dim, att_dim, embed_dim, vocab_size
    return {
        "embedding": u(ks[0], (V, De)),
        "wk": u(ks[1], (E, A)),       "bk": u(ks[2], (1, A)),
        "wq": u(ks[3], (D, A)),       "bq": u(ks[4], (1, A)),
        "wv": u(ks[5], (E, E)),       "bv": u(ks[6], (1, E)),
        "wbeta": u(ks[7], (D, E)),    "bbeta": u(ks[8], (1, E)),
        "wih": u(ks[9], (De + E, 4 * D)),  "bih": u(ks[10], (1, 4 * D)),
        "whh": u(ks[11], (D, 4 * D)),      "bhh": u(ks[12], (1, 4 * D)),
        "wfc": u(ks[13], (D, V)),          "bfc": u(ks[14], (1, V)),
        "w_init_h": u(ks[15], (E, D)),     "b_init_h": u(ks[16], (1, D)),
        "w_init_c": u(ks[17], (E, D)),     "b_init_c": u(ks[18], (1, D)),
    }


if __name__ == "__main__":
    # Small, DecoderLSTM-consistent shapes.
    B = 2
    Hs = Ws = 4            # encoder spatial grid -> num_pixels = 16
    encoder_dim = 32
    decoder_dim = 32
    att_dim = 16
    embed_dim = 16
    vocab_size = 64
    max_len = 8            # caption length (incl. <start>/<end>)

    root = jax.random.PRNGKey(0)
    k_p, k_enc, k_cap = jax.random.split(root, 3)

    params = make_params(
        k_p, encoder_dim=encoder_dim, decoder_dim=decoder_dim,
        att_dim=att_dim, embed_dim=embed_dim, vocab_size=vocab_size)

    encoder_out = jax.random.normal(k_enc, (B, Hs, Ws, encoder_dim), jnp.float32)
    encoded_captions = jax.random.randint(k_cap, (B, max_len), 0, vocab_size,
                                          dtype=jnp.int32)
    # longest caption uses the full length so static T == max(decode_len)
    caption_lens = jnp.array([[6], [8]], dtype=jnp.int32)              # (B, 1)

    outs = decoder_lstm_forward(params, encoder_out, encoded_captions, caption_lens)
    outs = jax.block_until_ready(outs)

    predictions, alphas, caps_sorted, decode_len, sort_ind = outs
    assert predictions.shape == (B, max_len - 1, vocab_size)
    assert alphas.shape == (B, max_len - 1, Hs * Ws)
    assert bool(jnp.all(jnp.isfinite(predictions)))
    assert bool(jnp.all(jnp.isfinite(alphas)))
    print("KERNEL_OK")
</pallas_src>

<mosaic_0001>
module attributes {stable_mosaic.version = 11 : i64} {
  func.func @_decoder_step_kernel(%arg0: i32, %arg1: i32, %arg2: memref<1x8x512xf32, #tpu.memory_space<vmem>>, %arg3: memref<8x128x128xf32, #tpu.memory_space<vmem>>, %arg4: memref<8x128x128xf32, #tpu.memory_space<vmem>>, %arg5: memref<8x128xf32, #tpu.memory_space<vmem>>, %arg6: memref<8x128xf32, #tpu.memory_space<vmem>>, %arg7: memref<128x768xf32, #tpu.memory_space<vmem>>, %arg8: memref<1x128xf32, #tpu.memory_space<vmem>>, %arg9: memref<1x128xf32, #tpu.memory_space<vmem>>, %arg10: memref<128x512xf32, #tpu.memory_space<vmem>>, %arg11: memref<1x128xf32, #tpu.memory_space<vmem>>, %arg12: memref<1x8x128xf32, #tpu.memory_space<vmem>>, %arg13: memref<1x8x128xf32, #tpu.memory_space<vmem>>, %arg14: memref<8x128xf32, #tpu.memory_space<vmem>>, %arg15: memref<8x128xf32, #tpu.memory_space<vmem>>) attributes {dimension_semantics = [#tpu.dimension_semantics<parallel>, #tpu.dimension_semantics<arbitrary>], iteration_bounds = array<i64: 1, 7>, scalar_prefetch = 0 : i64, scratch_operands = 2 : i64, tpu.core_type = #tpu.core_type<tc>, window_params = [{transform_indices = @transform_0, window_bounds = array<i64: 1, 8, 512>}, {transform_indices = @transform_1, window_bounds = array<i64: 8, 128, 128>}, {transform_indices = @transform_2, window_bounds = array<i64: 8, 128, 128>}, {transform_indices = @transform_3, window_bounds = array<i64: 8, 128>}, {transform_indices = @transform_4, window_bounds = array<i64: 8, 128>}, {pipeline_mode = #tpu.pipeline_mode<synchronous>, transform_indices = @transform_5, window_bounds = array<i64: 128, 768>}, {pipeline_mode = #tpu.pipeline_mode<synchronous>, transform_indices = @transform_6, window_bounds = array<i64: 1, 128>}, {pipeline_mode = #tpu.pipeline_mode<synchronous>, transform_indices = @transform_7, window_bounds = array<i64: 1, 128>}, {pipeline_mode = #tpu.pipeline_mode<synchronous>, transform_indices = @transform_8, window_bounds = array<i64: 128, 512>}, {pipeline_mode = #tpu.pipeline_mode<synchronous>, transform_indices = @transform_9, window_bounds = array<i64: 1, 128>}, {transform_indices = @transform_10, window_bounds = array<i64: 1, 8, 128>}, {transform_indices = @transform_11, window_bounds = array<i64: 1, 8, 128>}]} {
    %c0_i32 = arith.constant 0 : i32
    %0 = arith.cmpi eq, %arg1, %c0_i32 : i32
    %1 = arith.extui %0 : i1 to i32
    %c0_i32_0 = arith.constant 0 : i32
    %2 = arith.cmpi ne, %1, %c0_i32_0 : i32
    scf.if %2 {
      %c0_45 = arith.constant 0 : index
      %c0_46 = arith.constant 0 : index
      %87 = vector.load %arg5[%c0_45, %c0_46] : memref<8x128xf32, #tpu.memory_space<vmem>>, vector<8x128xf32>
      %c0_47 = arith.constant 0 : index
      %c0_48 = arith.constant 0 : index
      %88 = vector.load %arg14[%c0_47, %c0_48] : memref<8x128xf32, #tpu.memory_space<vmem>>, vector<8x128xf32>
      tpu.vector_store %arg14[%c0_47, %c0_48], %87 {strides = array<i32>} : memref<8x128xf32, #tpu.memory_space<vmem>>, vector<8x128xf32>,
      %c0_49 = arith.constant 0 : index
      %c0_50 = arith.constant 0 : index
      %89 = vector.load %arg6[%c0_49, %c0_50] : memref<8x128xf32, #tpu.memory_space<vmem>>, vector<8x128xf32>
      %c0_51 = arith.constant 0 : index
      %c0_52 = arith.constant 0 : index
      %90 = vector.load %arg15[%c0_51, %c0_52] : memref<8x128xf32, #tpu.memory_space<vmem>>, vector<8x128xf32>
      tpu.vector_store %arg15[%c0_51, %c0_52], %89 {strides = array<i32>} : memref<8x128xf32, #tpu.memory_space<vmem>>, vector<8x128xf32>,
    } else {
    }
    %c0 = arith.constant 0 : index
    %c0_1 = arith.constant 0 : index
    %3 = vector.load %arg14[%c0, %c0_1] : memref<8x128xf32, #tpu.memory_space<vmem>>, vector<8x128xf32>
    %c0_2 = arith.constant 0 : index
    %c0_3 = arith.constant 0 : index
    %4 = vector.load %arg15[%c0_2, %c0_3] : memref<8x128xf32, #tpu.memory_space<vmem>>, vector<8x128xf32>
    %c0_4 = arith.constant 0 : index
    %c0_5 = arith.constant 0 : index
    %5 = vector.load %arg7[%c0_4, %c0_5] : memref<128x768xf32, #tpu.memory_space<vmem>>, vector<128x768xf32>
    %cst = arith.constant dense<0.000000e+00> : vector<8x768xf32>
    %6 = tpu.matmul %3, %5, %cst {dimension_numbers = #tpu.dot_dimension_numbers<[1], [0], [0], [1], [0, 0, 1, 1], [], []>} : vector<8x128xf32>, vector<128x768xf32>, vector<8x768xf32> -> vector<8x768xf32>
    %7 = vector.extract_strided_slice %6 {offsets = [0, 0], sizes = [8, 128], strides = [1, 1]} : vector<8x768xf32> to vector<8x128xf32>
    %c0_6 = arith.constant 0 : index
    %c0_7 = arith.constant 0 : index
    %8 = vector.load %arg8[%c0_6, %c0_7] : memref<1x128xf32, #tpu.memory_space<vmem>>, vector<1x128xf32>
    %9 = vector.broadcast %8 : vector<1x128xf32> to vector<8x128xf32>
    %10 = arith.addf %7, %9 : vector<8x128xf32>
    %11 = vector.extract_strided_slice %6 {offsets = [0, 128], sizes = [8, 128], strides = [1, 1]} : vector<8x768xf32> to vector<8x128xf32>
    %c0_8 = arith.constant 0 : index
    %c0_9 = arith.constant 0 : index
    %12 = vector.load %arg9[%c0_8, %c0_9] : memref<1x128xf32, #tpu.memory_space<vmem>>, vector<1x128xf32>
    %13 = vector.broadcast %12 : vector<1x128xf32> to vector<8x128xf32>
    %14 = arith.addf %11, %13 : vector<8x128xf32>
    %15 = vector.extract_strided_slice %6 {offsets = [0, 256], sizes = [8, 512], strides = [1, 1]} : vector<8x768xf32> to vector<8x512xf32>
    %16 = vector.shape_cast %10 : vector<8x128xf32> to vector<8x1x128xf32>
    %c0_10 = arith.constant 0 : index
    %c0_11 = arith.constant 0 : index
    %c0_12 = arith.constant 0 : index
    %17 = vector.load %arg3[%c0_10, %c0_11, %c0_12] : memref<8x128x128xf32, #tpu.memory_space<vmem>>, vector<8x128x128xf32>
    "tpu.trace_start"() <{level = 10 : i32, message = "bqa,bpa->bqp"}> : () -> ()
    %cst_13 = arith.constant dense<0.000000e+00> : vector<8x1x128xf32>
    %18 = tpu.matmul %16, %17, %cst_13 {dimension_numbers = #tpu.dot_dimension_numbers<[2], [2], [1], [1], [0, 0, 0, 1, 1, 1], [0], [0]>} : vector<8x1x128xf32>, vector<8x128x128xf32>, vector<8x1x128xf32> -> vector<8x1x128xf32>
    "tpu.trace_stop"() : () -> ()
    %19 = vector.shape_cast %18 : vector<8x1x128xf32> to vector<8x128xf32>
    %cst_14 = arith.constant 2.500000e-01 : f32
    %20 = vector.broadcast %cst_14 : f32 to vector<8x128xf32>
    %21 = arith.mulf %19, %20 : vector<8x128xf32>
    %cst_15 = arith.constant 0.000000e+00 : f32
    %22 = vector.broadcast %cst_15 : f32 to vector<8x128xf32>
    %23 = arith.maximumf %21, %22 : vector<8x128xf32>
    %c0_16 = arith.constant 0 : index
    %c0_17 = arith.constant 0 : index
    %24 = vector.load %arg11[%c0_16, %c0_17] : memref<1x128xf32, #tpu.memory_space<vmem>>, vector<1x128xf32>
    %25 = vector.broadcast %24 : vector<1x128xf32> to vector<8x128xf32>
    %26 = arith.addf %23, %25 : vector<8x128xf32>
    %cst_18 = arith.constant dense<0xFF800000> : vector<8xf32>
    %27 = vector.multi_reduction <maximumf>, %26, %cst_18 [1] : vector<8x128xf32> to vector<8xf32>
    %28 = vector.shape_cast %27 : vector<8xf32> to vector<8x1xf32>
    %29 = vector.broadcast %28 : vector<8x1xf32> to vector<8x128xf32>
    %30 = arith.subf %26, %29 : vector<8x128xf32>
    %31 = math.exp %30 : vector<8x128xf32>
    %cst_19 = arith.constant dense<0.000000e+00> : vector<8xf32>
    %32 = vector.multi_reduction <add>, %31, %cst_19 [1] : vector<8x128xf32> to vector<8xf32>
    %33 = vector.shape_cast %32 : vector<8xf32> to vector<8x1xf32>
    %cst_20 = arith.constant 1.000000e+00 : f32
    %34 = vector.broadcast %cst_20 : f32 to vector<8x1xf32>
    %35 = arith.divf %34, %33 : vector<8x1xf32>
    %36 = vector.broadcast %35 : vector<8x1xf32> to vector<8x128xf32>
    %37 = arith.mulf %31, %36 : vector<8x128xf32>
    %38 = vector.shape_cast %37 : vector<8x128xf32> to vector<8x1x128xf32>
    %c0_21 = arith.constant 0 : index
    %c0_22 = arith.constant 0 : index
    %c0_23 = arith.constant 0 : index
    %39 = vector.load %arg4[%c0_21, %c0_22, %c0_23] : memref<8x128x128xf32, #tpu.memory_space<vmem>>, vector<8x128x128xf32>
    "tpu.trace_start"() <{level = 10 : i32, message = "bqp,bpe->bqe"}> : () -> ()
    %cst_24 = arith.constant dense<0.000000e+00> : vector<8x1x128xf32>
    %40 = tpu.matmul %38, %39, %cst_24 {dimension_numbers = #tpu.dot_dimension_numbers<[2], [1], [1], [2], [0, 0, 0, 1, 1, 2], [0], [0]>} : vector<8x1x128xf32>, vector<8x128x128xf32>, vector<8x1x128xf32> -> vector<8x1x128xf32>
    "tpu.trace_stop"() : () -> ()
    %41 = vector.shape_cast %40 : vector<8x1x128xf32> to vector<8x128xf32>
    %42 = arith.negf %14 : vector<8x128xf32>
    %43 = math.exp %42 : vector<8x128xf32>
    %cst_25 = arith.constant 1.000000e+00 : f32
    %44 = vector.broadcast %cst_25 : f32 to vector<8x128xf32>
    %45 = arith.addf %44, %43 : vector<8x128xf32>
    %46 = arith.divf %44, %45 : vector<8x128xf32>
    %47 = arith.mulf %46, %41 : vector<8x128xf32>
    %c0_26 = arith.constant 0 : index
    %c0_27 = arith.constant 0 : index
    %c0_28 = arith.constant 0 : index
    %48 = vector.load %arg2[%c0_26, %c0_27, %c0_28] : memref<1x8x512xf32, #tpu.memory_space<vmem>>, vector<1x8x512xf32>
    %49 = vector.shape_cast %48 : vector<1x8x512xf32> to vector<8x512xf32>
    %c0_29 = arith.constant 0 : index
    %c0_30 = arith.constant 0 : index
    %50 = vector.load %arg10[%c0_29, %c0_30] : memref<128x512xf32, #tpu.memory_space<vmem>>, vector<128x512xf32>
    %cst_31 = arith.constant dense<0.000000e+00> : vector<8x512xf32>
    %51 = tpu.matmul %47, %50, %cst_31 {dimension_numbers = #tpu.dot_dimension_numbers<[1], [0], [0], [1], [0, 0, 1, 1], [], []>} : vector<8x128xf32>, vector<128x512xf32>, vector<8x512xf32> -> vector<8x512xf32>
    %52 = arith.addf %49, %51 : vector<8x512xf32>
    %53 = arith.addf %52, %15 : vector<8x512xf32>
    %54 = vector.extract_strided_slice %53 {offsets = [0, 0], sizes = [8, 128], strides = [1, 1]} : vector<8x512xf32> to vector<8x128xf32>
    %55 = arith.negf %54 : vector<8x128xf32>
    %56 = math.exp %55 : vector<8x128xf32>
    %cst_32 = arith.constant 1.000000e+00 : f32
    %57 = vector.broadcast %cst_32 : f32 to vector<8x128xf32>
    %58 = arith.addf %57, %56 : vector<8x128xf32>
    %59 = arith.divf %57, %58 : vector<8x128xf32>
    %60 = vector.extract_strided_slice %53 {offsets = [0, 128], sizes = [8, 128], strides = [1, 1]} : vector<8x512xf32> to vector<8x128xf32>
    %61 = arith.negf %60 : vector<8x128xf32>
    %62 = math.exp %61 : vector<8x128xf32>
    %cst_33 = arith.constant 1.000000e+00 : f32
    %63 = vector.broadcast %cst_33 : f32 to vector<8x128xf32>
    %64 = arith.addf %63, %62 : vector<8x128xf32>
    %65 = arith.divf %63, %64 : vector<8x128xf32>
    %66 = vector.extract_strided_slice %53 {offsets = [0, 256], sizes = [8, 128], strides = [1, 1]} : vector<8x512xf32> to vector<8x128xf32>
    %67 = math.tanh %66 : vector<8x128xf32>
    %68 = vector.extract_strided_slice %53 {offsets = [0, 384], sizes = [8, 128], strides = [1, 1]} : vector<8x512xf32> to vector<8x128xf32>
    %69 = arith.negf %68 : vector<8x128xf32>
    %70 = math.exp %69 : vector<8x128xf32>
    %cst_34 = arith.constant 1.000000e+00 : f32
    %71 = vector.broadcast %cst_34 : f32 to vector<8x128xf32>
    %72 = arith.addf %71, %70 : vector<8x128xf32>
    %73 = arith.divf %71, %72 : vector<8x128xf32>
    %74 = arith.mulf %65, %4 : vector<8x128xf32>
    %75 = arith.mulf %59, %67 : vector<8x128xf32>
    %76 = arith.addf %74, %75 : vector<8x128xf32>
    %77 = math.tanh %76 : vector<8x128xf32>
    %78 = arith.mulf %73, %77 : vector<8x128xf32>
    %c0_35 = arith.constant 0 : index
    %c0_36 = arith.constant 0 : index
    %79 = vector.load %arg14[%c0_35, %c0_36] : memref<8x128xf32, #tpu.memory_space<vmem>>, vector<8x128xf32>
    tpu.vector_store %arg14[%c0_35, %c0_36], %78 {strides = array<i32>} : memref<8x128xf32, #tpu.memory_space<vmem>>, vector<8x128xf32>,
    %c0_37 = arith.constant 0 : index
    %c0_38 = arith.constant 0 : index
    %80 = vector.load %arg15[%c0_37, %c0_38] : memref<8x128xf32, #tpu.memory_space<vmem>>, vector<8x128xf32>
    tpu.vector_store %arg15[%c0_37, %c0_38], %76 {strides = array<i32>} : memref<8x128xf32, #tpu.memory_space<vmem>>, vector<8x128xf32>,
    %c0_39 = arith.constant 0 : index
    %c0_40 = arith.constant 0 : index
    %c0_41 = arith.constant 0 : index
    %81 = vector.load %arg12[%c0_39, %c0_40, %c0_41] : memref<1x8x128xf32, #tpu.memory_space<vmem>>, vector<1x8x128xf32>
    %82 = vector.shape_cast %81 : vector<1x8x128xf32> to vector<8x128xf32>
    %83 = vector.shape_cast %78 : vector<8x128xf32> to vector<1x8x128xf32>
    tpu.vector_store %arg12[%c0_39, %c0_40, %c0_41], %83 {strides = array<i32>} : memref<1x8x128xf32, #tpu.memory_space<vmem>>, vector<1x8x128xf32>,
    %c0_42 = arith.constant 0 : index
    %c0_43 = arith.constant 0 : index
    %c0_44 = arith.constant 0 : index
    %84 = vector.load %arg13[%c0_42, %c0_43, %c0_44] : memref<1x8x128xf32, #tpu.memory_space<vmem>>, vector<1x8x128xf32>
    %85 = vector.shape_cast %84 : vector<1x8x128xf32> to vector<8x128xf32>
    %86 = vector.shape_cast %37 : vector<8x128xf32> to vector<1x8x128xf32>
    tpu.vector_store %arg13[%c0_42, %c0_43, %c0_44], %86 {strides = array<i32>} : memref<1x8x128xf32, #tpu.memory_space<vmem>>, vector<1x8x128xf32>,
    return
  }
  func.func @transform_0(%arg0: i32, %arg1: i32) -> (i32, i32, i32) {
    %c0_i32 = arith.constant 0 : i32
    %c0_i32_0 = arith.constant 0 : i32
    return %arg1, %arg0, %c0_i32 : i32, i32, i32
  }
  func.func @transform_1(%arg0: i32, %arg1: i32) -> (i32, i32, i32) {
    %c0_i32 = arith.constant 0 : i32
    %c0_i32_0 = arith.constant 0 : i32
    %c0_i32_1 = arith.constant 0 : i32
    return %arg0, %c0_i32, %c0_i32_0 : i32, i32, i32
  }
  func.func @transform_2(%arg0: i32, %arg1: i32) -> (i32, i32, i32) {
    %c0_i32 = arith.constant 0 : i32
    %c0_i32_0 = arith.constant 0 : i32
    %c0_i32_1 = arith.constant 0 : i32
    return %arg0, %c0_i32, %c0_i32_0 : i32, i32, i32
  }
  func.func @transform_3(%arg0: i32, %arg1: i32) -> (i32, i32) {
    %c0_i32 = arith.constant 0 : i32
    %c0_i32_0 = arith.constant 0 : i32
    return %arg0, %c0_i32 : i32, i32
  }
  func.func @transform_4(%arg0: i32, %arg1: i32) -> (i32, i32) {
    %c0_i32 = arith.constant 0 : i32
    %c0_i32_0 = arith.constant 0 : i32
    return %arg0, %c0_i32 : i32, i32
  }
  func.func @transform_5(%arg0: i32, %arg1: i32) -> (i32, i32) {
    %c0_i32 = arith.constant 0 : i32
    %c0_i32_0 = arith.constant 0 : i32
    %c0_i32_1 = arith.constant 0 : i32
    return %c0_i32, %c0_i32_0 : i32, i32
  }
  func.func @transform_6(%arg0: i32, %arg1: i32) -> (i32, i32) {
    %c0_i32 = arith.constant 0 : i32
    %c0_i32_0 = arith.constant 0 : i32
    %c0_i32_1 = arith.constant 0 : i32
    return %c0_i32, %c0_i32_0 : i32, i32
  }
  func.func @transform_7(%arg0: i32, %arg1: i32) -> (i32, i32) {
    %c0_i32 = arith.constant 0 : i32
    %c0_i32_0 = arith.constant 0 : i32
    %c0_i32_1 = arith.constant 0 : i32
    return %c0_i32, %c0_i32_0 : i32, i32
  }
  func.func @transform_8(%arg0: i32, %arg1: i32) -> (i32, i32) {
    %c0_i32 = arith.constant 0 : i32
    %c0_i32_0 = arith.constant 0 : i32
    %c0_i32_1 = arith.constant 0 : i32
    return %c0_i32, %c0_i32_0 : i32, i32
  }
  func.func @transform_9(%arg0: i32, %arg1: i32) -> (i32, i32) {
    %c0_i32 = arith.constant 0 : i32
    %c0_i32_0 = arith.constant 0 : i32
    %c0_i32_1 = arith.constant 0 : i32
    return %c0_i32, %c0_i32_0 : i32, i32
  }
  func.func @transform_10(%arg0: i32, %arg1: i32) -> (i32, i32, i32) {
    %c0_i32 = arith.constant 0 : i32
    %c0_i32_0 = arith.constant 0 : i32
    return %arg1, %arg0, %c0_i32 : i32, i32, i32
  }
  func.func @transform_11(%arg0: i32, %arg1: i32) -> (i32, i32, i32) {
    %c0_i32 = arith.constant 0 : i32
    %c0_i32_0 = arith.constant 0 : i32
    return %arg1, %arg0, %c0_i32 : i32, i32, i32
  }
}

</mosaic_0001>

<bundles_post_ra>
// kernel: tpu_custom_call.1
= control target key start
LH: loop header
LB: loop body
LE: loop exit
PB: predicated region body
PF: predicated region fallthrough
CT: control target
= control target key end

     0   :  { %s5633_s0 = inlined_call_operand.hbm [shape: f32[7,8,512], index: 0, kind: input, shape index: {}]   ;;  %s5634_s1 = inlined_call_operand.hbm [shape: f32[8,128,128], index: 1, kind: input, shape index: {}]   ;;  %s5635_s2 = inlined_call_operand.hbm [shape: f32[8,128,128], index: 2, kind: input, shape index: {}]   ;;  %s5636_s3 = inlined_call_operand.vmem [shape: f32[8,128], index: 3, kind: input, shape index: {}]   ;;  %s5637_s4 = inlined_call_operand.hbm [shape: f32[8,128], index: 4, kind: input, shape index: {}]   ;;  %s5638_s5 = inlined_call_operand.hbm [shape: f32[128,768], index: 5, kind: input, shape index: {}]   ;;  %s5639_s6 = inlined_call_operand.vmem [shape: f32[1,128], index: 6, kind: input, shape index: {}]   ;;  %s5640_s7 = inlined_call_operand.vmem [shape: f32[1,128], index: 7, kind: input, shape index: {}]   ;;  %s5641_s8 = inlined_call_operand.hbm [shape: f32[128,512], index: 8, kind: input, shape index: {}]   ;;  %s5642_s9 = inlined_call_operand.vmem [shape: f32[1,128], index: 9, kind: input, shape index: {}]   ;;  %s5643_s10 = inlined_call_operand.hbm [shape: f32[7,8,128], index: 10, kind: output, shape index: {0}]   ;;  %s5644_s11 = inlined_call_operand.hbm [shape: f32[7,8,128], index: 11, kind: output, shape index: {1}]  }
   0x1   :  { %5653 = sst [smem:[#allocation24_spill]] %s5634_s1 }
   0x2   :  { %5654 = sst [smem:[#allocation25_spill]] %s5639_s6 }
   0x3   :  { %5655 = sst [smem:[#allocation26_spill]] %s5640_s7 }
   0x4   :  { %5656 = sst [smem:[#allocation27_spill]] %s5642_s9 }
   0x5   :  { %5657 = sst [smem:[#allocation28_spill]] %s5643_s10 }
   0x6   :  { %5658 = sst [smem:[#allocation29_spill]] %s5644_s11 }
   0x7   :  { %17 = vsyncpa [#allocation5], 0 }
   0x8   :  { %19 = vsyncpa [#allocation5 + $0x1], 0 }
   0x9   :  { %20 = vsyncpa [#allocation8], 0 }
   0xa   :  { %21 = vsyncpa [#allocation11], 0 }
   0xb   :  { %22 = vsyncpa [#allocation14], 0 }
   0xc   :  { %23 = vsyncpa [#allocation6], 0 }
   0xd   :  { %25 = vsyncpa [#allocation6 + $0x1], 0 }
   0xe   :  { %26 = vsyncpa [#allocation17], 0 }
   0xf   :  { %28 = vsyncpa [#allocation17 + $0x1], 0  ;;  %s4952_s17 = smov 0   ;;  %s4954_s18 = smov 0  }
  0x10   :  { %s4956_s19 = smov 0   ;;  %s4958_s20 = smov 0  }
  0x11   :  { %s4960_s21 = smov 0   ;;  %s4962_s22 = smov 0  }
  0x12 LB: > { %s5645_s23 = sadd.s32 4294967295, %s4872_s22   ;;  %p2991_p0 = scmp.ge.s32.totalorder %s4872_s22, 1  ;;  %s4872_s22 = sphi %s4962_s22, %s34_s22   ;;  %s4868_s21 = sphi %s4960_s21, %s5685_s21   ;;  %s4864_s20 = sphi %s4958_s20, %s5684_s20   ;;  %s4860_s19 = sphi %s4956_s19, %s5683_s19   ;;  %s4856_s18 = sphi %s4954_s18, %s5682_s18   ;;  %s4852_s17 = sphi %s4952_s17, %s5681_s17  }
  0x13   : > { %p4986_p1 = scmp.eq.s32.totalorder %s5645_s23, 0  ;;  %p344_p2 = scmp.lt.s32.totalorder %s4872_s22, 8 }
  0x14   : > { %s4874_s26 = smov [#allocation7]   ;;  %s4875_s29 = smov [#allocation10]  }
  0x15   : > { %s5659_s24 = scalar_select %p4986_p1, 1, 0 }
  0x16   : > { %p4991_p3 = pnand %p2991_p0, %p344_p2  ;;  %s360_s27 = sshll.u32 %s4874_s26, 4  ;;  %s4995_s27 = int_to_ptr.vmem [resolvable:$true] %s360_s27 }
  0x17   : > { %s400_s30 = sshll.u32 %s4875_s29, 4  ;;  %s4876_s12 = smov [#allocation9]   ;;  %s5005_s30 = int_to_ptr.vmem [resolvable:$true] %s400_s30 }
  0x18   : > { %s5660_s25 = scalar_select %p4991_p3, 1, 0 }
  0x19   : > { %p4436_p4 = pneg %p4991_p3  ;;  %s5007_s13 = sshll.u32 %s4876_s12, 4  ;;  %s378_s13 = int_to_ptr.vmem [resolvable:$true] %s5007_s13 }
  0x1a   : > { %s5662_s1 = sld [smem:[#allocation24_spill]] }
  0x1b   : > { %p5001_p5 = pnand %p4436_p4, %p4986_p1 }
  0x1d   : > { %p5017_p7 = pneg %p5001_p5 }
  0x20   : > { %s4576_s16 = scalar_lea.hbm %s5662_s1, 16384 }
  0x21   : > { %p4577_p6 = scmp.ne.s32.totalorder %s5662_s1, %s4576_s16  ;;  %p4583_p10 = scmp.lt.u32.totalorder %s4576_s16, %s5662_s1 }
  0x23   : > { %p4579_p8 = pnand %p5017_p7, %p4577_p6 }
  0x25   : > { %p4580_p9 = pneg %p4579_p8 }
  0x27   : > { %p4585_p11 = pnand %p4583_p10, %p4580_p9 }
  0x29   : > { %4588 = shalt.err (!%p4585_p11)
}
  0x2a   : > { %s4589_s23 = scalar_lea.vmem %s4995_s27, 16384  ;;  %p4597_p2 = scmp.lt.s32.totalorder %s4995_s27, %s4995_s27 }
  0x2b   : > { %p4590_p12 = scmp.ne.s32.totalorder %s4995_s27, %s4589_s23  ;;  %p4598_p4 = scmp.lt.s32.totalorder %s4589_s23, %s4589_s23 }
  0x2d   : > { %p4592_p13 = pnand %p4590_p12, %p5017_p7  ;;  %p4599_p6 = por %p4598_p4, %p4597_p2 }
  0x2f   : > { %p4593_p0 = pneg %p4592_p13 }
  0x31   : > { %p4600_p8 = pnand %p4599_p6, %p4593_p0 }
  0x33   : > { %4603 = shalt.err (!%p4600_p8)
}
  0x34   : > { %s4877_s14 = smov 128   ;;  %s4878_s15 = smov 8  }
  0x35   : > { %4439 = dma.hbm_to_vmem [thread:$0]  (!%p5001_p5), %s5662_s1, 16384, %s4995_s27, [#allocation8], %s4877_s14, %s4877_s14, %s4878_s15  }
  0x36   : > { %s4604_s23 = scalar_lea.hbm %s5637_s4, 128 }
  0x37   : > { %p4605_p9 = scmp.ne.s32.totalorder %s5637_s4, %s4604_s23  ;;  %p4611_p12 = scmp.lt.u32.totalorder %s4604_s23, %s5637_s4 }
  0x39   : > { %p4607_p10 = pnand %p4605_p9, %p5017_p7 }
  0x3b   : > { %p4608_p11 = pneg %p4607_p10 }
  0x3d   : > { %p4613_p13 = pnand %p4611_p12, %p4608_p11 }
  0x3f   : > { %4616 = shalt.err (!%p4613_p13)
}
  0x40   : > { %s4617_s27 = scalar_lea.vmem %s5005_s30, 128  ;;  %p4625_p6 = scmp.lt.s32.totalorder %s5005_s30, %s5005_s30 }
  0x41   : > { %p4618_p0 = scmp.ne.s32.totalorder %s5005_s30, %s4617_s27  ;;  %p4626_p8 = scmp.lt.s32.totalorder %s4617_s27, %s4617_s27 }
  0x43   : > { %p4620_p2 = pnand %p4618_p0, %p5017_p7  ;;  %p4627_p9 = por %p4626_p8, %p4625_p6 }
  0x45   : > { %p4621_p4 = pneg %p4620_p2 }
  0x47   : > { %p4628_p10 = pnand %p4627_p9, %p4621_p4 }
  0x49   : > { %4631 = shalt.err (!%p4628_p10)
}
  0x4a   : > { %4445 = dma.hbm_to_vmem [thread:$0]  (!%p5001_p5), %s5637_s4, 128, %s5005_s30, [#allocation11]  }
  0x4b   : > { %s4632_s16 = scalar_lea.hbm %s5635_s2, 16384 }
  0x4c   : > { %p4633_p11 = scmp.ne.s32.totalorder %s5635_s2, %s4632_s16  ;;  %p4639_p0 = scmp.lt.u32.totalorder %s4632_s16, %s5635_s2 }
  0x4e   : > { %p4635_p12 = pnand %p4633_p11, %p5017_p7 }
  0x50   : > { %p4636_p13 = pneg %p4635_p12 }
  0x52   : > { %p4641_p2 = pnand %p4639_p0, %p4636_p13 }
  0x54   : > { %4644 = shalt.err (!%p4641_p2)
}
  0x55   : > { %s4645_s27 = scalar_lea.vmem %s378_s13, 16384  ;;  %p4653_p9 = scmp.lt.s32.totalorder %s378_s13, %s378_s13 }
  0x56   : > { %p4646_p4 = scmp.ne.s32.totalorder %s378_s13, %s4645_s27  ;;  %p4654_p10 = scmp.lt.s32.totalorder %s4645_s27, %s4645_s27 }
  0x58   : > { %p4648_p6 = pnand %p4646_p4, %p5017_p7  ;;  %p4655_p3 = por %p4654_p10, %p4653_p9 }
  0x5a   : > { %p4649_p8 = pneg %p4648_p6 }
  0x5c   : > { %p4656_p1 = pnand %p4655_p3, %p4649_p8 }
  0x5e   : > { %4659 = shalt.err (!%p4656_p1)
}
  0x5f   : > { %4442 = dma.hbm_to_vmem [thread:$0]  (!%p5001_p5), %s5635_s2, 16384, %s378_s13, [#allocation8], %s4877_s14, %s4877_s14, %s4878_s15  }
  0x60   : > { %s4879_s7 = smov [#allocation12]   ;;  %s4660_s26 = scalar_lea.hbm %s5638_s5, 12288 }
  0x61   : > { %s410_s9 = sshll.u32 %s4879_s7, 4  ;;  %p4661_p1 = scmp.ne.s32.totalorder %s5638_s5, %s4660_s26  ;;  %s411_s9 = int_to_ptr.vmem [resolvable:$true] %s410_s9 }
  0x62   : > { %p4667_p12 = scmp.lt.u32.totalorder %s4660_s26, %s5638_s5 }
  0x63   : > { %p4663_p3 = pnand %p4661_p1, %p5017_p7 }
  0x65   : > { %p4664_p11 = pneg %p4663_p3 }
  0x67   : > { %p4669_p13 = pnand %p4667_p12, %p4664_p11 }
  0x69   : > { %4672 = shalt.err (!%p4669_p13)
}
  0x6a   : > { %s4673_s13 = scalar_lea.vmem %s411_s9, 12288  ;;  %p4681_p6 = scmp.lt.s32.totalorder %s411_s9, %s411_s9 }
  0x6b   : > { %p4674_p0 = scmp.ne.s32.totalorder %s411_s9, %s4673_s13  ;;  %p4682_p8 = scmp.lt.s32.totalorder %s4673_s13, %s4673_s13 }
  0x6d   : > { %p4676_p2 = pnand %p4674_p0, %p5017_p7  ;;  %p4683_p9 = por %p4682_p8, %p4681_p6 }
  0x6f   : > { %p4677_p4 = pneg %p4676_p2 }
  0x71   : > { %p4684_p10 = pnand %p4683_p9, %p4677_p4 }
  0x73   : > { %4687 = shalt.err (!%p4684_p10)
}
  0x74   : > { %s4880_s14 = smov 768   ;;  %s4881_s15 = smov 48  }
  0x75   : > { %4448 = dma.hbm_to_vmem [thread:$0]  (!%p5001_p5), %s5638_s5, 12288, %s411_s9, [#allocation11], %s4880_s14, %s4880_s14, %s4881_s15  }
  0x76   : > { %s4882_s7 = smov [#allocation13]   ;;  %s4688_s29 = scalar_lea.hbm %s5641_s8, 8192 }
  0x77   : > { %s429_s11 = sshll.u32 %s4882_s7, 4  ;;  %p4689_p1 = scmp.ne.s32.totalorder %s5641_s8, %s4688_s29  ;;  %s430_s11 = int_to_ptr.vmem [resolvable:$true] %s429_s11 }
  0x78   : > { %p4695_p12 = scmp.lt.u32.totalorder %s4688_s29, %s5641_s8 }
  0x79   : > { %p4691_p3 = pnand %p4689_p1, %p5017_p7 }
  0x7b   : > { %p4692_p11 = pneg %p4691_p3 }
  0x7d   : > { %p4697_p13 = pnand %p4695_p12, %p4692_p11 }
  0x7f   : > { %4700 = shalt.err (!%p4697_p13)
}
  0x80   : > { %s4701_s9 = scalar_lea.vmem %s430_s11, 8192  ;;  %p4709_p6 = scmp.lt.s32.totalorder %s430_s11, %s430_s11 }
  0x81   : > { %p4702_p0 = scmp.ne.s32.totalorder %s430_s11, %s4701_s9  ;;  %p4710_p8 = scmp.lt.s32.totalorder %s4701_s9, %s4701_s9 }
  0x83   : > { %p4704_p2 = pnand %p4702_p0, %p5017_p7  ;;  %p4711_p9 = por %p4710_p8, %p4709_p6 }
  0x85   : > { %p4705_p4 = pneg %p4704_p2 }
  0x87   : > { %p4712_p10 = pnand %p4711_p9, %p4705_p4 }
  0x89   : > { %4715 = shalt.err (!%p4712_p10)
}
  0x8a   : > { %s4883_s14 = smov 512   ;;  %s4884_s10 = smov 32  }
  0x8b   : > { %4451 = dma.hbm_to_vmem [thread:$0]  (!%p5001_p5), %s5641_s8, 8192, %s430_s11, [#allocation14], %s4883_s14, %s4883_s14, %s4884_s10  }
  0x8c   : > { %s2990_s6 = sadd.s32 4294967294, %s4872_s22   ;;  %s43_s7 = sadd.s32 1, %s4868_s21 }
  0x8d   : > { %s55_s16 = sadd.s32 1, %s4860_s19  ;;  %p44_p7 = scmp.ge.s32.totalorder %s43_s7, 7 }
  0x8e   : > { %p62_p1 = scmp.ne.s32.totalorder %s4860_s19, %s4856_s18  ;;  %p63_p3 = scmp.eq.s32.totalorder %s4872_s22, 0 }
  0x8f   : > { %p68_p11 = scmp.ne.s32.totalorder %s4856_s18, %s4852_s17  ;;  %s5687_s7 = smov (%p44_p7, %s43_s7), 0 }
  0x90   : > { %p5132_p12 = por %p63_p3, %p62_p1  ;;  %p5665_p13 = scmp.ne.s32.totalorder %s5659_s24, 0 }
  0x91   : > { %s50_s26 = ssub.s32 %s4868_s21, %s5687_s7  ;;  %s5667_s29 = sadd.s32 4294967295, %s4872_s22  }
  0x92   : > { %p5138_p5 = por %p5665_p13, %p68_p11  ;;  %p303_p0 = scmp.eq.s32.totalorder %s5667_s29, 6 }
  0x93   : > { %p53_p2 = scmp.eq.s32.totalorder %s50_s26, 0  ;;  %p309_p4 = scmp.eq.s32.totalorder %s2990_s6, 6 }
  0x94   : > { %p5146_p6 = por %p303_p0, %p62_p1  ;;  %p4468_p8 = scmp.lt.s32.totalorder %s4872_s22, 7 }
  0x95   : > { %s5152_s23 = scalar_select %p53_p2, %s4860_s19, %s55_s16  }
  0x96   : > { %s5668_s12 = scalar_select %p5146_p6, 1, 0 }
  0x97   : > { %p5154_p9 = por %p309_p4, %p68_p11  ;;  %s446_s13 = sand.u32 1, %s4860_s19  }
  0x98   : > { %s2999_s9 = sshll.u32 %s446_s13, 5  ;;  %s3025_s14 = sshll.u32 %s4868_s21, 9 }
  0x99   : > { %s5669_s27 = scalar_select %p5154_p9, 1, 0 }
  0x9a   : > { %s5163_s30 = scalar_lea.hbm %s5633_s0, %s3025_s14  ;;  %s450_s6 = scalar_lea.vmem [#allocation4], %s2999_s9 }
  0x9b   : > { %s460_s26 = sshll.u32 %s450_s6, 4  ;;  %p5169_p10 = pnand %p4468_p8, %p5132_p12  ;;  %s5165_s26 = int_to_ptr.vmem [resolvable:$true] %s460_s26 }
  0x9c   : > { %s447_s29 = scalar_lea.sflag [#allocation5], %s446_s13  ;;  %s4716_s1 = scalar_lea.hbm %s5163_s30, 512 }
  0x9d   : > { %p4717_p7 = scmp.ne.s32.totalorder %s5163_s30, %s4716_s1  ;;  %p4718_p1 = pneg %p5169_p10 }
  0x9e   : > { %s4721_s10 = scalar_lea.hbm %s5633_s0, 3584  ;;  %p4722_p12 = scmp.lt.u32.totalorder %s5163_s30, %s5633_s0 }
  0x9f   : > { %p4719_p3 = pnand %p4718_p1, %p4717_p7  ;;  %p4723_p13 = scmp.lt.u32.totalorder %s4721_s10, %s4716_s1 }
  0xa0   : > { %p4725_p2 = scmp.lt.u32.totalorder %s4716_s1, %s5163_s30 }
  0xa1   : > { %p4720_p11 = pneg %p4719_p3  ;;  %p4724_p0 = por %p4723_p13, %p4722_p12 }
  0xa3   : > { %p4726_p4 = por %p4725_p2, %p4724_p0 }
  0xa5   : > { %p4727_p8 = pnand %p4726_p4, %p4720_p11 }
  0xa7   : > { %4730 = shalt.err (!%p4727_p8)
}
  0xa8   : > { %s4731_s13 = scalar_lea.vmem %s5165_s26, 512  ;;  %s4885_s6 = smov [#allocation4]  }
  0xa9   : > { %p4732_p7 = scmp.ne.s32.totalorder %s5165_s26, %s4731_s13  ;;  %s4736_s9 = sshll.u32 %s4885_s6, 4  ;;  %s4737_s9 = int_to_ptr.vmem [resolvable:$false] %s4736_s9 }
  0xaa   : > { %s4738_s14 = scalar_lea.vmem %s4737_s9, 1024  ;;  %p4739_p6 = scmp.lt.s32.totalorder %s5165_s26, %s4737_s9 }
  0xab   : > { %p4734_p3 = pnand %p4732_p7, %p4718_p1  ;;  %p4740_p12 = scmp.lt.s32.totalorder %s4738_s14, %s4731_s13 }
  0xad   : > { %p4735_p9 = pneg %p4734_p3  ;;  %p4741_p13 = por %p4740_p12, %p4739_p6 }
  0xaf   : > { %p4742_p0 = pnand %p4741_p13, %p4735_p9 }
  0xb1   : > { %4745 = shalt.err (!%p4742_p0)
}
  0xb2   : > { %4455 = dma.hbm_to_vmem [thread:$0]  (!%p5169_p10), %s5163_s30, 512, %s5165_s26, %s447_s29  }
  0xb3   : > { %p5671_p11 = scmp.ne.s32.totalorder %s5660_s25, 0 }
  0xb4   : > { %s5201_s1 = sand.u32 (!%p5671_p11), 1, %s4856_s18  }
  0xb5   : > { %469 = sbr.rel (%p5671_p11) target bundleno = 1783 (0x6f7), region = 60  ;;  %s3003_s10 = sshll.u32 (!%p5671_p11), %s5201_s1, 5 }
  0xb6   : > { %s472_s28 = scalar_lea.sflag (!%p5671_p11), [#allocation5], %s5201_s1  ;;  %s5205_s15 = scalar_lea.vmem (!%p5671_p11), [#allocation4], %s3003_s10 }
  0xbc   : > { %4827 = dma.done.wait (%p5138_p5), %s472_s28, 512  }
  0xbd   : > { %4829 = vsyncadd (%p5138_p5), %s472_s28, 4294966784  ;;  %p5672_p6 = scmp.ne.s32.totalorder %s5659_s24, 0 }
  0xbf   : > { %4831 = dma.done.wait (%p5672_p6), [#allocation8], 32768  }
  0xc0   : > { %4833 = vsyncadd (%p5672_p6), [#allocation8], 4294934528 }
  0xc1   : > { %4835 = dma.done.wait (%p5672_p6), [#allocation11], 12416  }
  0xc2   : > { %4837 = vsyncadd (%p5672_p6), [#allocation11], 4294954880 }
  0xc3   : > { %4839 = dma.done.wait (%p5672_p6), [#allocation14], 8192  }
  0xc4   : > { %4841 = vsyncadd (%p5672_p6), [#allocation14], 4294959104  ;;  %s3009_s25 = sshll.u32 %s5201_s1, 3  ;;  %p3011_p5 = scmp.ne.s32.totalorder %s4864_s20, 0 }
  0xc5   : > { %s5224_s11 = scalar_lea.vmem [#allocation15], %s3009_s25  ;;  %s5226_s30 = scalar_lea.vmem [#allocation16], %s3009_s25  ;;  %v553_v0 = vld [vmem:[%s5636_s3] sm:$0xff] (!%p3011_p5)  ;;  %v555_v1 = vld [vmem:[#allocation10] sm:$0xff] (!%p3011_p5) }
  0xc6   : > { %552 = sbr.rel (%p3011_p5) target bundleno = 205 (0xcd), region = 88  ;;  %554 = vst [vmem:[#allocation2] sm:$0xff] (!%p3011_p5), %v553_v0  ;;  %556 = vst [vmem:[#allocation3] sm:$0xff] (!%p3011_p5), %v555_v1 }
  0xcd PF: > { %v560_v2 = vld [vmem:[#allocation12 + $0x8] sm:$0xff]  ;;  %v566_v3 = vld [vmem:[#allocation12 + $0x38] sm:$0xff]  ;;  %v559_v4 = vld [vmem:[#allocation12] sm:$0xff]  ;;  %v4886_v9 = vmov 0.0   ;;  %vm4888_vm0 = vmmov 0   ;;  %s5673_s13 = sld [smem:[#allocation25_spill]] }
  0xce   : > { %v3858_v5 = vpack.c.bf16 %v566_v3, %v560_v2  ;;  %v565_v6 = vld [vmem:[#allocation12 + $0x30] sm:$0xff]  ;;  %v572_v7 = vld [vmem:[#allocation12 + $0x68] sm:$0xff]  ;;  %v578_v8 = vld [vmem:[#allocation12 + $0x98] sm:$0xff]  ;;  %719 = vmatprep.mubr.f32.mxu0 %v4886_v9  ;;  %790 = vmatprep.mubr.f32.mxu1 %v4886_v9  ;;  %s5674_s14 = sld [smem:[#allocation27_spill]]  ;;  %vm1670_vm1 = vcmask 1041409   ;;  %vm1673_vm2 = vcmask 1042434  }
  0xcf   : > { %v3860_v10 = vpack.c.bf16 %v565_v6, %v559_v4  ;;  %v3862_v11 = vpack.c.bf16 %v578_v8, %v572_v7  ;;  %v571_v12 = vld [vmem:[#allocation12 + $0x60] sm:$0xff]  ;;  %v577_v13 = vld [vmem:[#allocation12 + $0x90] sm:$0xff]  ;;  %v584_v14 = vld [vmem:[#allocation12 + $0xc8] sm:$0xff]  ;;  %vm1676_vm3 = vcmask 1043459   ;;  %vm1679_vm4 = vcmask 1044484   ;;  %s5675_s25 = sld [smem:[#allocation26_spill]] }
  0xd0   : > { %3859 = vmatprep.subr.bf16.mxu0 %v3858_v5  ;;  %v590_v15 = vld [vmem:[#allocation12 + $0xf8] sm:$0xff]  ;;  %v3864_v16 = vpack.c.bf16 %v577_v13, %v571_v12  ;;  %v583_v18 = vld [vmem:[#allocation12 + $0xc0] sm:$0xff]  ;;  %v589_v19 = vld [vmem:[#allocation12 + $0xf0] sm:$0xff]  ;;  %vm1682_vm5 = vcmask 1045509   ;;  %vm1685_vm6 = vcmask 1046534   ;;  %vm1688_vm7 = vcmask 1047559  }
  0xd1   : > { %3861 = vmatpush1.bf16.msra.mxu0 %v3860_v10  ;;  %v3866_v17 = vpack.c.bf16 %v590_v15, %v584_v14  ;;  %v596_v20 = vld [vmem:[#allocation12 + $0x128] sm:$0xff]  ;;  %v602_v21 = vld [vmem:[#allocation12 + $0x158] sm:$0xff]  ;;  %v3868_v22 = vpack.c.bf16 %v589_v19, %v583_v18  ;;  %v595_v24 = vld [vmem:[#allocation12 + $0x120] sm:$0xff]  ;;  %s5652_s26 = sshll.u32 %s4864_s20, 7  ;;  %s5676_s29 = sld [smem:[#allocation29_spill]] }
  0xd2   : > { %3863 = vmatprep.subr.bf16.mxu0 %v3862_v11  ;;  %v3870_v23 = vpack.c.bf16 %v602_v21, %v596_v20  ;;  %v601_v25 = vld [vmem:[#allocation12 + $0x150] sm:$0xff]  ;;  %v608_v26 = vld [vmem:[#allocation12 + $0x188] sm:$0xff]  ;;  %v614_v27 = vld [vmem:[#allocation12 + $0x1b8] sm:$0xff]  ;;  %s2805_s6 = sshll.u32 %s5226_s30, 4  ;;  %s2777_s9 = scalar_lea.sflag [#allocation17], %s5201_s1  ;;  %s2806_s6 = int_to_ptr.vmem [resolvable:$true] %s2805_s6 }
  0xd3   : > { %v562_v28 = vld [vmem:[#allocation12 + $0x18] sm:$0xff]  ;;  %v568_v29 = vld [vmem:[#allocation12 + $0x48] sm:$0xff]  ;;  %v561_v30 = vld [vmem:[#allocation12 + $0x10] sm:$0xff]  ;;  %v3872_v31 = vpack.c.bf16 %v601_v25, %v595_v24  ;;  %v3874_v36 = vpack.c.bf16 %v614_v27, %v608_v26  ;;  %p5677_p10 = scmp.ne.s32.totalorder %s5668_s12, 0  ;;  %s4890_s10 = smov [#allocation16]  }
  0xd4   : > { %v607_v32 = vld [vmem:[#allocation12 + $0x180] sm:$0xff]  ;;  %v613_v33 = vld [vmem:[#allocation12 + $0x1b0] sm:$0xff]  ;;  %v3890_v34 = vpack.c.bf16 %v568_v29, %v562_v28  ;;  %v620_v37 = vld [vmem:[#allocation12 + $0x1e8] sm:$0xff]  ;;  %s4750_s28 = sshll.u32 %s4890_s10, 4  ;;  %s4751_s28 = int_to_ptr.vmem [resolvable:$false] %s4750_s28 }
  0xd5   : > { %3865 = vmatpush1.bf16.msra.mxu0 %v3864_v16  ;;  %v567_v35 = vld [vmem:[#allocation12 + $0x40] sm:$0xff]  ;;  %v626_v38 = vld [vmem:[#allocation12 + $0x218] sm:$0xff]  ;;  %v580_v41 = vld [vmem:[#allocation12 + $0xa8] sm:$0xff]  ;;  %v3876_v46 = vpack.c.bf16 %v613_v33, %v607_v32  ;;  %p4753_p4 = scmp.lt.s32.totalorder %s2806_s6, %s4751_s28 }
  0xd6   : > { %3867 = vmatprep.subr.bf16.mxu0 %v3866_v17  ;;  %v3892_v39 = vpack.c.bf16 %v567_v35, %v561_v30  ;;  %v574_v40 = vld [vmem:[#allocation12 + $0x78] sm:$0xff]  ;;  %3891 = vmatprep.subr.bf16.mxu1 %v3890_v34  ;;  %v573_v42 = vld [vmem:[#allocation12 + $0x70] sm:$0xff]  ;;  %v579_v43 = vld [vmem:[#allocation12 + $0xa0] sm:$0xff]  ;;  %v3878_v50 = vpack.c.bf16 %v626_v38, %v620_v37 }
  0xd7   : > { %v3894_v44 = vpack.c.bf16 %v580_v41, %v574_v40  ;;  %v3896_v45 = vpack.c.bf16 %v579_v43, %v573_v42  ;;  %v619_v47 = vld [vmem:[#allocation12 + $0x1e0] sm:$0xff]  ;;  %v586_v48 = vld [vmem:[#allocation12 + $0xd8] sm:$0xff]  ;;  %v592_v49 = vld [vmem:[#allocation12 + $0x108] sm:$0xff] }
  0xd8   : > { %3893 = vmatpush1.bf16.msra.mxu1 %v3892_v39  ;;  %v625_v51 = vld [vmem:[#allocation12 + $0x210] sm:$0xff]  ;;  %v3898_v52 = vpack.c.bf16 %v592_v49, %v586_v48  ;;  %v591_v54 = vld [vmem:[#allocation12 + $0x100] sm:$0xff]  ;;  %v632_v55 = vld [vmem:[#allocation12 + $0x248] sm:$0xff] }
  0xd9   : > { %3869 = vmatpush1.bf16.msra.mxu0 %v3868_v22  ;;  %3895 = vmatprep.subr.bf16.mxu1 %v3894_v44  ;;  %v585_v53 = vld [vmem:[#allocation12 + $0xd0] sm:$0xff]  ;;  %v638_v56 = vld [vmem:[#allocation12 + $0x278] sm:$0xff]  ;;  %v604_v59 = vld [vmem:[#allocation12 + $0x168] sm:$0xff]  ;;  %v3880_v60 = vpack.c.bf16 %v625_v51, %v619_v47 }
  0xda   : > { %3871 = vmatprep.subr.bf16.mxu0 %v3870_v23  ;;  %v3900_v57 = vpack.c.bf16 %v591_v54, %v585_v53  ;;  %v598_v58 = vld [vmem:[#allocation12 + $0x138] sm:$0xff]  ;;  %v597_v62 = vld [vmem:[#allocation12 + $0x130] sm:$0xff]  ;;  %v603_v63 = vld [vmem:[#allocation12 + $0x160] sm:$0xff]  ;;  %v3882_v0 = vpack.c.bf16 %v638_v56, %v632_v55 }
  0xdb   : > { %v3902_v61 = vpack.c.bf16 %v604_v59, %v598_v58  ;;  %v631_v1 = vld [vmem:[#allocation12 + $0x240] sm:$0xff]  ;;  %v637_v2 = vld [vmem:[#allocation12 + $0x270] sm:$0xff]  ;;  %v610_v3 = vld [vmem:[#allocation12 + $0x198] sm:$0xff]  ;;  %v3904_v7 = vpack.c.bf16 %v603_v63, %v597_v62 }
  0xdc   : > { %3897 = vmatpush1.bf16.msra.mxu1 %v3896_v45  ;;  %v644_v4 = vld [vmem:[#allocation12 + $0x2a8] sm:$0xff]  ;;  %v650_v5 = vld [vmem:[#allocation12 + $0x2d8] sm:$0xff]  ;;  %v3884_v8 = vpack.c.bf16 %v637_v2, %v631_v1  ;;  %v643_v10 = vld [vmem:[#allocation12 + $0x2a0] sm:$0xff] }
  0xdd   : > { %3873 = vmatpush1.bf16.msra.mxu0 %v3872_v31  ;;  %3899 = vmatprep.subr.bf16.mxu1 %v3898_v52  ;;  %v616_v6 = vld [vmem:[#allocation12 + $0x1c8] sm:$0xff]  ;;  %v609_v12 = vld [vmem:[#allocation12 + $0x190] sm:$0xff]  ;;  %v615_v13 = vld [vmem:[#allocation12 + $0x1c0] sm:$0xff]  ;;  %v3886_v14 = vpack.c.bf16 %v650_v5, %v644_v4 }
  0xde   : > { %3875 = vmatprep.subr.bf16.mxu0 %v3874_v36  ;;  %v3906_v11 = vpack.c.bf16 %v616_v6, %v610_v3  ;;  %v649_v15 = vld [vmem:[#allocation12 + $0x2d0] sm:$0xff]  ;;  %v622_v16 = vld [vmem:[#allocation12 + $0x1f8] sm:$0xff]  ;;  %v628_v17 = vld [vmem:[#allocation12 + $0x228] sm:$0xff]  ;;  %v3908_v20 = vpack.c.bf16 %v615_v13, %v609_v12 }
  0xdf   : > { %v564_v18 = vld [vmem:[#allocation12 + $0x28] sm:$0xff]  ;;  %v570_v19 = vld [vmem:[#allocation12 + $0x58] sm:$0xff]  ;;  %v3888_v21 = vpack.c.bf16 %v649_v15, %v643_v10  ;;  %v563_v22 = vld [vmem:[#allocation12 + $0x20] sm:$0xff]  ;;  %v3910_v23 = vpack.c.bf16 %v628_v17, %v622_v16 }
  0xe0   : > { %3901 = vmatpush1.bf16.msra.mxu1 %v3900_v57  ;;  %v621_v24 = vld [vmem:[#allocation12 + $0x1f0] sm:$0xff]  ;;  %v627_v25 = vld [vmem:[#allocation12 + $0x220] sm:$0xff]  ;;  %v3922_v26 = vpack.c.bf16 %v570_v19, %v564_v18  ;;  %v634_v28 = vld [vmem:[#allocation12 + $0x258] sm:$0xff] }
  0xe1   : > { %3877 = vmatpush1.bf16.msra.mxu0 %v3876_v46  ;;  %3903 = vmatprep.subr.bf16.mxu1 %v3902_v61  ;;  %v569_v27 = vld [vmem:[#allocation12 + $0x50] sm:$0xff]  ;;  %v640_v29 = vld [vmem:[#allocation12 + $0x288] sm:$0xff]  ;;  %v582_v31 = vld [vmem:[#allocation12 + $0xb8] sm:$0xff]  ;;  %v3912_v33 = vpack.c.bf16 %v627_v25, %v621_v24 }
  0xe2   : > { %3879 = vmatprep.subr.bf16.mxu0 %v3878_v50  ;;  %v576_v30 = vld [vmem:[#allocation12 + $0x88] sm:$0xff]  ;;  %v3924_v34 = vpack.c.bf16 %v569_v27, %v563_v22  ;;  %v575_v35 = vld [vmem:[#allocation12 + $0x80] sm:$0xff]  ;;  %v3914_v36 = vpack.c.bf16 %v640_v29, %v634_v28  ;;  %v633_v37 = vld [vmem:[#allocation12 + $0x250] sm:$0xff] }
  0xe3   : > { %v5234_v32 = vld [vmem:[#allocation2] sm:$0xff]  ;;  %v639_v38 = vld [vmem:[#allocation12 + $0x280] sm:$0xff]  ;;  %v3926_v39 = vpack.c.bf16 %v582_v31, %v576_v30  ;;  %v581_v40 = vld [vmem:[#allocation12 + $0xb0] sm:$0xff] }
  0xe4   : > { %3905 = vmatpush1.bf16.msra.mxu1 %v3904_v7  ;;  %v646_v41 = vld [vmem:[#allocation12 + $0x2b8] sm:$0xff]  ;;  %v652_v42 = vld [vmem:[#allocation12 + $0x2e8] sm:$0xff]  ;;  %v3916_v45 = vpack.c.bf16 %v639_v38, %v633_v37  ;;  %v3928_v46 = vpack.c.bf16 %v581_v40, %v575_v35  ;;  %v645_v48 = vld [vmem:[#allocation12 + $0x2b0] sm:$0xff] }
  0xe5   : > { %3881 = vmatpush1.bf16.msra.mxu0 %v3880_v60  ;;  %3907 = vmatprep.subr.bf16.mxu1 %v3906_v11  ;;  %v588_v43 = vld [vmem:[#allocation12 + $0xe8] sm:$0xff]  ;;  %v594_v44 = vld [vmem:[#allocation12 + $0x118] sm:$0xff]  ;;  %v3918_v47 = vpack.c.bf16 %v652_v42, %v646_v41  ;;  %v651_v49 = vld [vmem:[#allocation12 + $0x2e0] sm:$0xff] }
  0xe6   : > { %3883 = vmatprep.subr.bf16.mxu0 %v3882_v0  ;;  %v3930_v50 = vpack.c.bf16 %v594_v44, %v588_v43  ;;  %v587_v51 = vld [vmem:[#allocation12 + $0xe0] sm:$0xff]  ;;  %v593_v52 = vld [vmem:[#allocation12 + $0x110] sm:$0xff]  ;;  %v600_v53 = vld [vmem:[#allocation12 + $0x148] sm:$0xff]  ;;  %v3920_v55 = vpack.c.bf16 %v651_v49, %v645_v48  ;;  %v4887_v0 = vmov 0.0|0.0  }
  0xe7   : > { %v606_v54 = vld [vmem:[#allocation12 + $0x178] sm:$0xff]  ;;  %v3932_v56 = vpack.c.bf16 %v593_v52, %v587_v51  ;;  %v599_v58 = vld [vmem:[#allocation12 + $0x140] sm:$0xff]  ;;  %v605_v59 = vld [vmem:[#allocation12 + $0x170] sm:$0xff] }
  0xe8   : > { %3909 = vmatpush1.bf16.msra.mxu1 %v3908_v20  ;;  %v3934_v57 = vpack.c.bf16 %v606_v54, %v600_v53  ;;  %v612_v60 = vld [vmem:[#allocation12 + $0x1a8] sm:$0xff]  ;;  %v618_v61 = vld [vmem:[#allocation12 + $0x1d8] sm:$0xff]  ;;  %v3936_v62 = vpack.c.bf16 %v605_v59, %v599_v58  ;;  %v611_v63 = vld [vmem:[#allocation12 + $0x1a0] sm:$0xff] }
  0xe9   : > { %3885 = vmatpush1.bf16.msra.mxu0 %v3884_v8  ;;  %3911 = vmatprep.subr.bf16.mxu1 %v3910_v23  ;;  %v3938_v1 = vpack.c.bf16 %v618_v61, %v612_v60  ;;  %v617_v2 = vld [vmem:[#allocation12 + $0x1d0] sm:$0xff]  ;;  %v942_v3 = vld [vmem:[#allocation7] sm:$0xff]  ;;  %v943_v4 = vld [vmem:[#allocation7 + $0x8] sm:$0xff] }
  0xea   : > { %3887 = vmatprep.subr.bf16.mxu0 %v3886_v14  ;;  %v624_v5 = vld [vmem:[#allocation12 + $0x208] sm:$0xff]  ;;  %v630_v6 = vld [vmem:[#allocation12 + $0x238] sm:$0xff]  ;;  %v3940_v7 = vpack.c.bf16 %v617_v2, %v611_v63  ;;  %v3955_v8 = vpack.c.bf16 %v943_v4, %v942_v3  ;;  %v623_v11 = vld [vmem:[#allocation12 + $0x200] sm:$0xff] }
  0xeb   : > { %v3942_v10 = vpack.c.bf16 %v630_v6, %v624_v5  ;;  %v629_v12 = vld [vmem:[#allocation12 + $0x230] sm:$0xff]  ;;  %v636_v13 = vld [vmem:[#allocation12 + $0x268] sm:$0xff]  ;;  %v642_v14 = vld [vmem:[#allocation12 + $0x298] sm:$0xff] }
  0xec   : > { %3913 = vmatpush1.bf16.msra.mxu1 %v3912_v33  ;;  %v3944_v15 = vpack.c.bf16 %v629_v12, %v623_v11  ;;  %v635_v16 = vld [vmem:[#allocation12 + $0x260] sm:$0xff]  ;;  %v3946_v17 = vpack.c.bf16 %v642_v14, %v636_v13  ;;  %v641_v18 = vld [vmem:[#allocation12 + $0x290] sm:$0xff]  ;;  %v944_v19 = vld [vmem:[#allocation7 + $0x10] sm:$0xff]  ;;  %v889_v11 = vlaneseq }
  0xed   : > { %3889 = vmatpush1.bf16.msra.mxu0 %v3888_v21  ;;  %3915 = vmatprep.subr.bf16.mxu1 %v3914_v36  ;;  %v945_v20 = vld [vmem:[#allocation7 + $0x18] sm:$0xff]  ;;  %v648_v21 = vld [vmem:[#allocation12 + $0x2c8] sm:$0xff]  ;;  %v654_v22 = vld [vmem:[#allocation12 + $0x2f8] sm:$0xff]  ;;  %v3948_v23 = vpack.c.bf16 %v641_v18, %v635_v16 }
  0xee   : > { %3923 = vmatprep.subr.bf16.mxu0 %v3922_v26  ;;  %v3958_v24 = vpack.c.bf16 %v945_v20, %v944_v19  ;;  %v3950_v25 = vpack.c.bf16 %v654_v22, %v648_v21  ;;  %v647_v26 = vld [vmem:[#allocation12 + $0x2c0] sm:$0xff]  ;;  %v653_v27 = vld [vmem:[#allocation12 + $0x2f0] sm:$0xff]  ;;  %v946_v29 = vld [vmem:[#allocation7 + $0x20] sm:$0xff]  ;;  %v890_v13 = vshrl.u32 %v889_v11, 7 }
  0xef   : > { %v3952_v28 = vpack.c.bf16 %v653_v27, %v647_v26  ;;  %v947_v30 = vld [vmem:[#allocation7 + $0x28] sm:$0xff]  ;;  %v958_v33 = vld [vmem:[#allocation7 + $0x80] sm:$0xff]  ;;  %v948_v36 = vld [vmem:[#allocation7 + $0x30] sm:$0xff] }
  0xf0   : > { %720 = vmatmul.mubr.f32.vlgmr.msra.gmra.mrb[0].mxu0 %v5234_v32  ;;  %3917 = vmatpush1.bf16.msra.mxu1 %v3916_v45  ;;  %v3961_v31 = vpack.c.bf16 %v947_v30, %v946_v29  ;;  %v949_v37 = vld [vmem:[#allocation7 + $0x38] sm:$0xff]  ;;  %v950_v42 = vld [vmem:[#allocation7 + $0x40] sm:$0xff]  ;;  %v951_v43 = vld [vmem:[#allocation7 + $0x48] sm:$0xff] }
  0xf1   : > { %3925 = vmatpush1.bf16.msra.mxu0 %v3924_v34  ;;  %861 = vmatprep.mubr.f32.mxu0 %v4886_v9  ;;  %v959_v34 = vld [vmem:[#allocation7 + $0x88] sm:$0xff]  ;;  %v3964_v38 = vpack.c.bf16 %v949_v37, %v948_v36  ;;  %v961_v40 = vld [vmem:[#allocation7 + $0x98] sm:$0xff]  ;;  %v3967_v44 = vpack.c.bf16 %v951_v43, %v950_v42  ;;  %v954_v53 = vld [vmem:[#allocation7 + $0x60] sm:$0xff] }
  0xf2   : > { %3927 = vmatprep.subr.bf16.mxu0 %v3926_v39  ;;  %3919 = vmatprep.subr.bf16.mxu1 %v3918_v47  ;;  %v3979_v35 = vpack.c.bf16 %v959_v34, %v958_v33  ;;  %v960_v39 = vld [vmem:[#allocation7 + $0x90] sm:$0xff]  ;;  %v963_v45 = vld [vmem:[#allocation7 + $0xa8] sm:$0xff]  ;;  %v953_v48 = vld [vmem:[#allocation7 + $0x58] sm:$0xff] }
  0xf3   : > { %v3982_v41 = vpack.c.bf16 %v961_v40, %v960_v39  ;;  %v952_v47 = vld [vmem:[#allocation7 + $0x50] sm:$0xff]  ;;  %v965_v51 = vld [vmem:[#allocation7 + $0xb8] sm:$0xff]  ;;  %v955_v54 = vld [vmem:[#allocation7 + $0x68] sm:$0xff] }
  0xf4   : > { %3921 = vmatpush1.bf16.msra.mxu1 %v3920_v55  ;;  %v3970_v49 = vpack.c.bf16 %v953_v48, %v952_v47  ;;  %v3973_v55 = vpack.c.bf16 %v955_v54, %v954_v53  ;;  %v956_v59 = vld [vmem:[#allocation7 + $0x70] sm:$0xff]  ;;  %v957_v60 = vld [vmem:[#allocation7 + $0x78] sm:$0xff]  ;;  %v970_v2 = vld [vmem:[#allocation7 + $0xe0] sm:$0xff] }
  0xf5   : > { %3929 = vmatpush1.bf16.msra.mxu0 %v3928_v46  ;;  %3954 = vmatprep.subr.bf16.mxu1 %v4887_v0  ;;  %v3976_v61 = vpack.c.bf16 %v957_v60, %v956_v59  ;;  %v969_v63 = vld [vmem:[#allocation7 + $0xd8] sm:$0xff]  ;;  %v971_v3 = vld [vmem:[#allocation7 + $0xe8] sm:$0xff]  ;;  %v972_v5 = vld [vmem:[#allocation7 + $0xf0] sm:$0xff] }
  0xf6   : > { %3931 = vmatprep.subr.bf16.mxu0 %v3930_v50  ;;  %v964_v50 = vld [vmem:[#allocation7 + $0xb0] sm:$0xff]  ;;  %v3997_v4 = vpack.c.bf16 %v971_v3, %v970_v2  ;;  %v973_v6 = vld [vmem:[#allocation7 + $0xf8] sm:$0xff]  ;;  %v974_v19 = vld [vmem:[#allocation7 + $0x100] sm:$0xff] }
  0xf7   : > { %791 = vmatmul.mubr.f32.vlgmr.msra.gmra.mrb[0].mxu1 %v5234_v32  ;;  %v3988_v52 = vpack.c.bf16 %v965_v51, %v964_v50  ;;  %v3012_v14 = vld [vmem:[%s5673_s13] ss:$0 sm:$0xff]  ;;  %v975_v20 = vld [vmem:[#allocation7 + $0x108] sm:$0xff]  ;;  %v994_v43 = vld [vmem:[#allocation7 + $0x1a0] sm:$0xff]  ;;  %s5553_s13 = scalar_lea.hbm %s5676_s29, %s5652_s26 }
  0xf8   : > { %3330 = vmatprep.mubr.msk.f32.mxu1 %vm4888_vm0, %v4886_v9  ;;  %v976_v34 = vld [vmem:[#allocation7 + $0x110] sm:$0xff]  ;;  %v979_v42 = vld [vmem:[#allocation7 + $0x128] sm:$0xff]  ;;  %v981_v47 = vld [vmem:[#allocation7 + $0x138] sm:$0xff] }
  0xf9   : > { %3933 = vmatpush1.bf16.msra.mxu0 %v3932_v56  ;;  %v966_v56 = vld [vmem:[#allocation7 + $0xc0] sm:$0xff]  ;;  %v992_v37 = vld [vmem:[#allocation7 + $0x190] sm:$0xff]  ;;  %v983_v53 = vld [vmem:[#allocation7 + $0x148] sm:$0xff] }
  0xfa   : > { %3935 = vmatprep.subr.bf16.mxu0 %v3934_v57  ;;  %v967_v57 = vld [vmem:[#allocation7 + $0xc8] sm:$0xff]  ;;  %v996_v48 = vld [vmem:[#allocation7 + $0x1b0] sm:$0xff]  ;;  %v998_v54 = vld [vmem:[#allocation7 + $0x1c0] sm:$0xff] }
  0xfb   : > { %v3991_v58 = vpack.c.bf16 %v967_v57, %v966_v56  ;;  %v985_v59 = vld [vmem:[#allocation7 + $0x158] sm:$0xff]  ;;  %v1000_v60 = vld [vmem:[#allocation7 + $0x1d0] sm:$0xff]  ;;  %v987_v2 = vld [vmem:[#allocation7 + $0x168] sm:$0xff] }
  0xfc   : > { %v1002_v3 = vld [vmem:[#allocation7 + $0x1e0] sm:$0xff]  ;;  %v1005_v11 = vld [vmem:[#allocation7 + $0x1f8] sm:$0xff] }
  0xfd   : > { %3937 = vmatpush1.bf16.msra.mxu0 %v3936_v62  ;;  %3956 = vmatpush3.bf16.xpose.msra.mxu1 %v3955_v8  ;;  %v968_v62 = vld [vmem:[#allocation7 + $0xd0] sm:$0xff]  ;;  %v4889_v8 = vmov 1966171168  }
  0xfe   : > { %3939 = vmatprep.subr.bf16.mxu0 %v3938_v1  ;;  %3957 = vmatprep.subr.bf16.mxu1 %v4887_v0  ;;  %v3994_v1 = vpack.c.bf16 %v969_v63, %v968_v62 }
 0x101   : > { %3941 = vmatpush1.bf16.msra.mxu0 %v3940_v7  ;;  %v4000_v7 = vpack.c.bf16 %v973_v6, %v972_v5 }
 0x102   : > { %3943 = vmatprep.subr.bf16.mxu0 %v3942_v10  ;;  %v887_v10 = vunpack.c.l.s4 %v4889_v8  ;;  %v989_v8 = vld [vmem:[#allocation7 + $0x178] sm:$0xff] }
 0x104   : > { %v888_v12 = vunpack.c.0.s8 %v887_v10  ;;  %v1004_v10 = vld [vmem:[#allocation7 + $0x1f0] sm:$0xff] }
 0x105   : > { %3945 = vmatpush1.bf16.msra.mxu0 %v3944_v15  ;;  %3959 = vmatpush3.bf16.xpose.msra.mxu1 %v3958_v24  ;;  %v991_v24 = vld [vmem:[#allocation7 + $0x188] sm:$0xff] }
 0x106   : > { %3947 = vmatprep.subr.bf16.mxu0 %v3946_v17  ;;  %3960 = vmatprep.subr.bf16.mxu1 %v4887_v0  ;;  %v891_v15 = vsub.s32 %v888_v12, %v890_v13  ;;  %v4048_v13 = vpack.c.bf16 %v1005_v11, %v1004_v10  ;;  %v1040_v11 = vld [vmem:[#allocation7 + $0x310] sm:$0xff] }
 0x109   : > { %3949 = vmatpush1.bf16.msra.mxu0 %v3948_v23  ;;  %v990_v23 = vld [vmem:[#allocation7 + $0x180] sm:$0xff] }
 0x10a   : > { %3951 = vmatprep.subr.bf16.mxu0 %v3950_v25  ;;  %v4003_v25 = vpack.c.bf16 %v975_v20, %v974_v19  ;;  %v4027_v29 = vpack.c.bf16 %v991_v24, %v990_v23  ;;  %v1008_v23 = vld [vmem:[#allocation7 + $0x210] sm:$0xff]  ;;  %v1009_v24 = vld [vmem:[#allocation7 + $0x218] sm:$0xff] }
 0x10d   : > { %3953 = vmatpush1.bf16.msra.mxu0 %v3952_v28  ;;  %3962 = vmatpush3.bf16.xpose.msra.mxu1 %v3961_v31 }
 0x10e   : > { %3978 = vmatprep.subr.bf16.mxu0 %v4887_v0  ;;  %3963 = vmatprep.subr.bf16.mxu1 %v4887_v0 }
 0x110   : > { %862 = vmatmul.mubr.f32.vlgmr.msra.gmra.mrb[2].mxu0 %v5234_v32  ;;  %v962_v32 = vld [vmem:[#allocation7 + $0xa0] sm:$0xff] }
 0x111   : > { %v3985_v46 = vpack.c.bf16 %v963_v45, %v962_v32  ;;  %3365 = vmatprep.mubr.msk.f32.mxu0 %vm4888_vm0, %v4886_v9 }
 0x115   : > { %3965 = vmatpush3.bf16.xpose.msra.mxu1 %v3964_v38  ;;  %v993_v38 = vld [vmem:[#allocation7 + $0x198] sm:$0xff] }
 0x116   : > { %3980 = vmatpush3.bf16.xpose.msra.mxu0 %v3979_v35  ;;  %3966 = vmatprep.subr.bf16.mxu1 %v4887_v0  ;;  %v977_v35 = vld [vmem:[#allocation7 + $0x118] sm:$0xff]  ;;  %v4030_v40 = vpack.c.bf16 %v993_v38, %v992_v37  ;;  %v1012_v38 = vld [vmem:[#allocation7 + $0x230] sm:$0xff] }
 0x117   : > { %3981 = vmatprep.subr.bf16.mxu0 %v4887_v0  ;;  %v4006_v39 = vpack.c.bf16 %v977_v35, %v976_v34  ;;  %v1027_v34 = vld [vmem:[#allocation7 + $0x2a8] sm:$0xff] }
 0x11d   : > { %3968 = vmatpush3.bf16.xpose.msra.mxu1 %v3967_v44  ;;  %v995_v44 = vld [vmem:[#allocation7 + $0x1a8] sm:$0xff] }
 0x11e   : > { %3983 = vmatpush3.bf16.xpose.msra.mxu0 %v3982_v41  ;;  %3969 = vmatprep.subr.bf16.mxu1 %v4887_v0  ;;  %v978_v41 = vld [vmem:[#allocation7 + $0x120] sm:$0xff]  ;;  %v4033_v45 = vpack.c.bf16 %v995_v44, %v994_v43 }
 0x11f   : > { %3984 = vmatprep.subr.bf16.mxu0 %v4887_v0  ;;  %v4009_v32 = vpack.c.bf16 %v979_v42, %v978_v41  ;;  %v1029_v41 = vld [vmem:[#allocation7 + $0x2b8] sm:$0xff]  ;;  %v1014_v44 = vld [vmem:[#allocation7 + $0x240] sm:$0xff] }
 0x125   : > { %3971 = vmatpush3.bf16.xpose.msra.mxu1 %v3970_v49  ;;  %v997_v49 = vld [vmem:[#allocation7 + $0x1b8] sm:$0xff] }
 0x126   : > { %3986 = vmatpush3.bf16.xpose.msra.mxu0 %v3985_v46  ;;  %3972 = vmatprep.subr.bf16.mxu1 %v4887_v0  ;;  %v980_v46 = vld [vmem:[#allocation7 + $0x130] sm:$0xff]  ;;  %v4036_v51 = vpack.c.bf16 %v997_v49, %v996_v48 }
 0x127   : > { %3987 = vmatprep.subr.bf16.mxu0 %v4887_v0  ;;  %v4012_v50 = vpack.c.bf16 %v981_v47, %v980_v46  ;;  %v1031_v46 = vld [vmem:[#allocation7 + $0x2c8] sm:$0xff]  ;;  %v1016_v49 = vld [vmem:[#allocation7 + $0x250] sm:$0xff] }
 0x12d   : > { %3974 = vmatpush3.bf16.xpose.msra.mxu1 %v3973_v55  ;;  %v999_v55 = vld [vmem:[#allocation7 + $0x1c8] sm:$0xff] }
 0x12e   : > { %3989 = vmatpush3.bf16.xpose.msra.mxu0 %v3988_v52  ;;  %3975 = vmatprep.subr.bf16.mxu1 %v4887_v0  ;;  %v982_v52 = vld [vmem:[#allocation7 + $0x140] sm:$0xff]  ;;  %v4039_v57 = vpack.c.bf16 %v999_v55, %v998_v54 }
 0x12f   : > { %3990 = vmatprep.subr.bf16.mxu0 %v4887_v0  ;;  %v4015_v56 = vpack.c.bf16 %v983_v53, %v982_v52  ;;  %v1033_v52 = vld [vmem:[#allocation7 + $0x2d8] sm:$0xff]  ;;  %v1018_v55 = vld [vmem:[#allocation7 + $0x260] sm:$0xff] }
 0x135   : > { %3977 = vmatpush3.bf16.xpose.msra.mxu1 %v3976_v61  ;;  %v1001_v61 = vld [vmem:[#allocation7 + $0x1d8] sm:$0xff] }
 0x136   : > { %3992 = vmatpush3.bf16.xpose.msra.mxu0 %v3991_v58  ;;  %4002 = vmatprep.subr.bf16.mxu1 %v4887_v0  ;;  %v984_v58 = vld [vmem:[#allocation7 + $0x150] sm:$0xff]  ;;  %v4042_v63 = vpack.c.bf16 %v1001_v61, %v1000_v60 }
 0x137   : > { %3993 = vmatprep.subr.bf16.mxu0 %v4887_v0  ;;  %v4018_v62 = vpack.c.bf16 %v985_v59, %v984_v58  ;;  %v1035_v58 = vld [vmem:[#allocation7 + $0x2e8] sm:$0xff]  ;;  %v1020_v61 = vld [vmem:[#allocation7 + $0x270] sm:$0xff] }
 0x13e   : > { %3995 = vmatpush3.bf16.xpose.msra.mxu0 %v3994_v1  ;;  %v986_v1 = vld [vmem:[#allocation7 + $0x160] sm:$0xff] }
 0x13f   : > { %3996 = vmatprep.subr.bf16.mxu0 %v4887_v0  ;;  %v4021_v5 = vpack.c.bf16 %v987_v2, %v986_v1  ;;  %v1037_v1 = vld [vmem:[#allocation7 + $0x2f8] sm:$0xff] }
 0x146   : > { %3998 = vmatpush3.bf16.xpose.msra.mxu0 %v3997_v4  ;;  %v1003_v4 = vld [vmem:[#allocation7 + $0x1e8] sm:$0xff] }
 0x147   : > { %3999 = vmatprep.subr.bf16.mxu0 %v4887_v0  ;;  %v4045_v6 = vpack.c.bf16 %v1003_v4, %v1002_v3  ;;  %v1038_v4 = vld [vmem:[#allocation7 + $0x300] sm:$0xff] }
 0x14e   : > { %4001 = vmatpush3.bf16.xpose.msra.mxu0 %v4000_v7  ;;  %v988_v7 = vld [vmem:[#allocation7 + $0x170] sm:$0xff] }
 0x14f   : > { %4026 = vmatprep.subr.bf16.mxu0 %v4887_v0  ;;  %v4024_v12 = vpack.c.bf16 %v989_v8, %v988_v7  ;;  %v1055_v7 = vld [vmem:[#allocation7 + $0x388] sm:$0xff] }
 0x1c3   : > { %v721_v16 = vpop.f32.mrb[0].mxu0 }
 0x1c4   : > { %v875_v17 = vadd.f32 %v3012_v14, %v721_v16  ;;  %v5265_v18 = vpop.f32.mrb[1].mxu0  ;;  %v1006_v14 = vld [vmem:[#allocation7 + $0x200] sm:$0xff] }
 0x1c5   : > { %v1022_v16 = vld [vmem:[#allocation7 + $0x280] sm:$0xff] }
 0x1c6   : > { %v885_v21 = vcombine.high %v875_v17, %v875_v17  ;;  %v892_v22 = vrot.slane %v875_v17, %v891_v15  ;;  %v1023_v17 = vld [vmem:[#allocation7 + $0x288] sm:$0xff] }
 0x1c8   : > { %v899_v26 = vrot.slane %v885_v21, %v891_v15  ;;  %v900_v27 = vcombine.high %v892_v22, %v892_v22  ;;  %v5267_v28 = vrot.slane %v892_v22, %v891_v15  ;;  %v4075_v21 = vpack.c.bf16 %v1023_v17, %v1022_v16  ;;  %v1042_v17 = vld [vmem:[#allocation7 + $0x320] sm:$0xff] }
 0x1ca   : > { %v901_v30 = vcombine.high %v899_v26, %v899_v26  ;;  %v5269_v31 = vrot.slane %v899_v26, %v891_v15  ;;  %v5271_v33 = vrot.slane %v900_v27, %v891_v15  ;;  %3331 = vmatmul.mubr.f32.vlgmr.msra.gmra.mrb[2].mxu1 %v5267_v28  ;;  %v930_v20 = vcombine.high %v5267_v28, %v5267_v28  ;;  %v1025_v26 = vld [vmem:[#allocation7 + $0x298] sm:$0xff] }
 0x1cb   : > { %4004 = vmatpush3.bf16.xpose.msra.mxu1 %v4003_v25  ;;  %3400 = vmatprep.mubr.msk.f32.mxu1 %vm4888_vm0, %v4886_v9  ;;  %v1024_v25 = vld [vmem:[#allocation7 + $0x290] sm:$0xff]  ;;  %v4054_v27 = vpack.c.bf16 %v1009_v24, %v1008_v23 }
 0x1cc   : > { %3366 = vmatmul.mubr.f32.vlgmr.msra.gmra.mrb[4].mxu0 %v5271_v33  ;;  %4005 = vmatprep.subr.bf16.mxu1 %v4887_v0  ;;  %v5278_v36 = vrot.slane %v901_v30, %v891_v15  ;;  %v1007_v15 = vld [vmem:[#allocation7 + $0x208] sm:$0xff]  ;;  %v932_v22 = vcombine.high %v5271_v33, %v5271_v33  ;;  %v4078_v28 = vpack.c.bf16 %v1025_v26, %v1024_v25  ;;  %v1026_v33 = vld [vmem:[#allocation7 + $0x2a0] sm:$0xff]  ;;  %v1044_v24 = vld [vmem:[#allocation7 + $0x330] sm:$0xff] }
 0x1cd   : > { %4028 = vmatpush3.bf16.xpose.msra.mxu0 %v4027_v29  ;;  %3435 = vmatprep.mubr.msk.f32.mxu0 %vm4888_vm0, %v4886_v9  ;;  %v4051_v19 = vpack.c.bf16 %v1007_v15, %v1006_v14  ;;  %v1010_v29 = vld [vmem:[#allocation7 + $0x220] sm:$0xff]  ;;  %v1011_v30 = vld [vmem:[#allocation7 + $0x228] sm:$0xff]  ;;  %v4081_v37 = vpack.c.bf16 %v1027_v34, %v1026_v33  ;;  %v1057_v14 = vld [vmem:[#allocation7 + $0x398] sm:$0xff] }
 0x1ce   : > { %4029 = vmatprep.subr.bf16.mxu0 %v4887_v0  ;;  %v4057_v35 = vpack.c.bf16 %v1011_v30, %v1010_v29  ;;  %v1045_v25 = vld [vmem:[#allocation7 + $0x338] sm:$0xff]  ;;  %v1060_v26 = vld [vmem:[#allocation7 + $0x3b0] sm:$0xff]  ;;  %v1046_v30 = vld [vmem:[#allocation7 + $0x340] sm:$0xff] }
 0x1cf   : > { %v1047_v33 = vld [vmem:[#allocation7 + $0x348] sm:$0xff]  ;;  %v1062_v34 = vld [vmem:[#allocation7 + $0x3c0] sm:$0xff] }
 0x1d3   : > { %4007 = vmatpush3.bf16.xpose.msra.mxu1 %v4006_v39  ;;  %v1013_v39 = vld [vmem:[#allocation7 + $0x238] sm:$0xff] }
 0x1d4   : > { %4008 = vmatprep.subr.bf16.mxu1 %v4887_v0  ;;  %v4060_v42 = vpack.c.bf16 %v1013_v39, %v1012_v38  ;;  %v1048_v39 = vld [vmem:[#allocation7 + $0x350] sm:$0xff] }
 0x1d5   : > { %4031 = vmatpush3.bf16.xpose.msra.mxu0 %v4030_v40  ;;  %v1028_v40 = vld [vmem:[#allocation7 + $0x2b0] sm:$0xff] }
 0x1d6   : > { %4032 = vmatprep.subr.bf16.mxu0 %v4887_v0  ;;  %v4084_v43 = vpack.c.bf16 %v1029_v41, %v1028_v40  ;;  %v1049_v40 = vld [vmem:[#allocation7 + $0x358] sm:$0xff]  ;;  %v1064_v41 = vld [vmem:[#allocation7 + $0x3d0] sm:$0xff] }
 0x1db   : > { %4010 = vmatpush3.bf16.xpose.msra.mxu1 %v4009_v32  ;;  %v1015_v32 = vld [vmem:[#allocation7 + $0x248] sm:$0xff] }
 0x1dc   : > { %4011 = vmatprep.subr.bf16.mxu1 %v4887_v0  ;;  %v4063_v47 = vpack.c.bf16 %v1015_v32, %v1014_v44  ;;  %v1050_v32 = vld [vmem:[#allocation7 + $0x360] sm:$0xff] }
 0x1dd   : > { %4034 = vmatpush3.bf16.xpose.msra.mxu0 %v4033_v45  ;;  %v1030_v45 = vld [vmem:[#allocation7 + $0x2c0] sm:$0xff] }
 0x1de   : > { %4035 = vmatprep.subr.bf16.mxu0 %v4887_v0  ;;  %v4087_v48 = vpack.c.bf16 %v1031_v46, %v1030_v45  ;;  %v1051_v45 = vld [vmem:[#allocation7 + $0x368] sm:$0xff]  ;;  %v1066_v46 = vld [vmem:[#allocation7 + $0x3e0] sm:$0xff] }
 0x1e3   : > { %4013 = vmatpush3.bf16.xpose.msra.mxu1 %v4012_v50  ;;  %v1017_v50 = vld [vmem:[#allocation7 + $0x258] sm:$0xff] }
 0x1e4   : > { %4014 = vmatprep.subr.bf16.mxu1 %v4887_v0  ;;  %v4066_v53 = vpack.c.bf16 %v1017_v50, %v1016_v49  ;;  %v1052_v50 = vld [vmem:[#allocation7 + $0x370] sm:$0xff] }
 0x1e5   : > { %4037 = vmatpush3.bf16.xpose.msra.mxu0 %v4036_v51  ;;  %v1032_v51 = vld [vmem:[#allocation7 + $0x2d0] sm:$0xff] }
 0x1e6   : > { %4038 = vmatprep.subr.bf16.mxu0 %v4887_v0  ;;  %v4090_v54 = vpack.c.bf16 %v1033_v52, %v1032_v51  ;;  %v1053_v51 = vld [vmem:[#allocation7 + $0x378] sm:$0xff]  ;;  %v1068_v52 = vld [vmem:[#allocation7 + $0x3f0] sm:$0xff] }
 0x1eb   : > { %4016 = vmatpush3.bf16.xpose.msra.mxu1 %v4015_v56  ;;  %v1019_v56 = vld [vmem:[#allocation7 + $0x268] sm:$0xff] }
 0x1ec   : > { %4017 = vmatprep.subr.bf16.mxu1 %v4887_v0  ;;  %v4069_v59 = vpack.c.bf16 %v1019_v56, %v1018_v55  ;;  %v931_v56 = vcombine.high %v5269_v31, %v5269_v31 }
 0x1ed   : > { %4040 = vmatpush3.bf16.xpose.msra.mxu0 %v4039_v57  ;;  %v1034_v57 = vld [vmem:[#allocation7 + $0x2e0] sm:$0xff] }
 0x1ee   : > { %4041 = vmatprep.subr.bf16.mxu0 %v4887_v0  ;;  %v4093_v60 = vpack.c.bf16 %v1035_v58, %v1034_v57  ;;  %v933_v57 = vcombine.high %v5278_v36, %v5278_v36 }
 0x1f3   : > { %4019 = vmatpush3.bf16.xpose.msra.mxu1 %v4018_v62  ;;  %v1021_v62 = vld [vmem:[#allocation7 + $0x278] sm:$0xff] }
 0x1f4   : > { %4020 = vmatprep.subr.bf16.mxu1 %v4887_v0  ;;  %v4072_v2 = vpack.c.bf16 %v1021_v62, %v1020_v61 }
 0x1f5   : > { %4043 = vmatpush3.bf16.xpose.msra.mxu0 %v4042_v63  ;;  %v1036_v63 = vld [vmem:[#allocation7 + $0x2f0] sm:$0xff] }
 0x1f6   : > { %4044 = vmatprep.subr.bf16.mxu0 %v4887_v0  ;;  %v4096_v3 = vpack.c.bf16 %v1037_v1, %v1036_v63 }
 0x1fb   : > { %4022 = vmatpush3.bf16.xpose.msra.mxu1 %v4021_v5  ;;  %v1039_v5 = vld [vmem:[#allocation7 + $0x308] sm:$0xff] }
 0x1fc   : > { %4023 = vmatprep.subr.bf16.mxu1 %v4887_v0  ;;  %v4099_v8 = vpack.c.bf16 %v1039_v5, %v1038_v4 }
 0x1fd   : > { %4046 = vmatpush3.bf16.xpose.msra.mxu0 %v4045_v6  ;;  %v1054_v6 = vld [vmem:[#allocation7 + $0x380] sm:$0xff] }
 0x1fe   : > { %4047 = vmatprep.subr.bf16.mxu0 %v4887_v0  ;;  %v4123_v10 = vpack.c.bf16 %v1055_v7, %v1054_v6 }
 0x203   : > { %4025 = vmatpush3.bf16.xpose.msra.mxu1 %v4024_v12  ;;  %v1041_v12 = vld [vmem:[#allocation7 + $0x318] sm:$0xff] }
 0x204   : > { %4050 = vmatprep.subr.bf16.mxu1 %v4887_v0  ;;  %v4102_v15 = vpack.c.bf16 %v1041_v12, %v1040_v11 }
 0x205   : > { %4049 = vmatpush3.bf16.xpose.msra.mxu0 %v4048_v13  ;;  %v1056_v13 = vld [vmem:[#allocation7 + $0x390] sm:$0xff] }
 0x206   : > { %4074 = vmatprep.subr.bf16.mxu0 %v4887_v0  ;;  %v4126_v16 = vpack.c.bf16 %v1057_v14, %v1056_v13  ;;  %v3014_v13 = vld [vmem:[%s5674_s14] ss:$0 sm:$0xff]  ;;  %s4746_s14 = scalar_lea.vmem %s2806_s6, 128 }
 0x207   : > { %p4747_p9 = scmp.ne.s32.totalorder %s2806_s6, %s4746_s14 }
 0x209   : > { %p4748_p1 = pnand %p4747_p9, %p5677_p10 }
 0x20a   : > { %3401 = vmatmul.mubr.f32.vlgmr.msra.gmra.mrb[4].mxu1 %v930_v20  ;;  %v1058_v20 = vld [vmem:[#allocation7 + $0x3a0] sm:$0xff] }
 0x20b   : > { %4052 = vmatpush3.bf16.xpose.msra.mxu1 %v4051_v19  ;;  %3470 = vmatprep.mubr.msk.f32.mxu1 %vm4888_vm0, %v4886_v9  ;;  %v1043_v19 = vld [vmem:[#allocation7 + $0x328] sm:$0xff]  ;;  %p4749_p2 = pneg %p4748_p1 }
 0x20c   : > { %3436 = vmatmul.mubr.f32.vlgmr.msra.gmra.mrb[6].mxu0 %v932_v22  ;;  %4053 = vmatprep.subr.bf16.mxu1 %v4887_v0  ;;  %v4105_v22 = vpack.c.bf16 %v1043_v19, %v1042_v17 }
 0x20d   : > { %4076 = vmatpush3.bf16.xpose.msra.mxu0 %v4075_v21  ;;  %3505 = vmatprep.mubr.msk.f32.mxu0 %vm4888_vm0, %v4886_v9  ;;  %v1059_v21 = vld [vmem:[#allocation7 + $0x3a8] sm:$0xff] }
 0x20e   : > { %4077 = vmatprep.subr.bf16.mxu0 %v4887_v0  ;;  %v4129_v23 = vpack.c.bf16 %v1059_v21, %v1058_v20 }
 0x213   : > { %4055 = vmatpush3.bf16.xpose.msra.mxu1 %v4054_v27  ;;  %v1061_v27 = vld [vmem:[#allocation7 + $0x3b8] sm:$0xff] }
 0x214   : > { %4056 = vmatprep.subr.bf16.mxu1 %v4887_v0  ;;  %v4132_v29 = vpack.c.bf16 %v1061_v27, %v1060_v26 }
 0x215   : > { %4079 = vmatpush3.bf16.xpose.msra.mxu0 %v4078_v28  ;;  %v4108_v28 = vpack.c.bf16 %v1045_v25, %v1044_v24 }
 0x216   : > { %4080 = vmatprep.subr.bf16.mxu0 %v4887_v0 }
 0x21b   : > { %4058 = vmatpush3.bf16.xpose.msra.mxu1 %v4057_v35  ;;  %v1063_v35 = vld [vmem:[#allocation7 + $0x3c8] sm:$0xff] }
 0x21c   : > { %4059 = vmatprep.subr.bf16.mxu1 %v4887_v0  ;;  %v4135_v38 = vpack.c.bf16 %v1063_v35, %v1062_v34 }
 0x21d   : > { %4082 = vmatpush3.bf16.xpose.msra.mxu0 %v4081_v37  ;;  %v4111_v37 = vpack.c.bf16 %v1047_v33, %v1046_v30 }
 0x21e   : > { %4083 = vmatprep.subr.bf16.mxu0 %v4887_v0 }
 0x223   : > { %4061 = vmatpush3.bf16.xpose.msra.mxu1 %v4060_v42  ;;  %v1065_v42 = vld [vmem:[#allocation7 + $0x3d8] sm:$0xff] }
 0x224   : > { %4062 = vmatprep.subr.bf16.mxu1 %v4887_v0  ;;  %v4138_v44 = vpack.c.bf16 %v1065_v42, %v1064_v41 }
 0x225   : > { %4085 = vmatpush3.bf16.xpose.msra.mxu0 %v4084_v43  ;;  %v4114_v43 = vpack.c.bf16 %v1049_v40, %v1048_v39 }
 0x226   : > { %4086 = vmatprep.subr.bf16.mxu0 %v4887_v0 }
 0x22b   : > { %4064 = vmatpush3.bf16.xpose.msra.mxu1 %v4063_v47  ;;  %v1067_v47 = vld [vmem:[#allocation7 + $0x3e8] sm:$0xff] }
 0x22c   : > { %4065 = vmatprep.subr.bf16.mxu1 %v4887_v0  ;;  %v4141_v49 = vpack.c.bf16 %v1067_v47, %v1066_v46 }
 0x22d   : > { %4088 = vmatpush3.bf16.xpose.msra.mxu0 %v4087_v48  ;;  %v4117_v48 = vpack.c.bf16 %v1051_v45, %v1050_v32 }
 0x22e   : > { %4089 = vmatprep.subr.bf16.mxu0 %v4887_v0 }
 0x233   : > { %4067 = vmatpush3.bf16.xpose.msra.mxu1 %v4066_v53  ;;  %v1069_v53 = vld [vmem:[#allocation7 + $0x3f8] sm:$0xff] }
 0x234   : > { %4068 = vmatprep.subr.bf16.mxu1 %v4887_v0  ;;  %v4144_v55 = vpack.c.bf16 %v1069_v53, %v1068_v52  ;;  %v1784_v52 = vld [vmem:[#allocation9] sm:$0xff]  ;;  %v1785_v53 = vld [vmem:[#allocation9 + $0x8] sm:$0xff] }
 0x235   : > { %4091 = vmatpush3.bf16.xpose.msra.mxu0 %v4090_v54  ;;  %v4120_v54 = vpack.c.bf16 %v1053_v51, %v1052_v50 }
 0x236   : > { %4092 = vmatprep.subr.bf16.mxu0 %v4887_v0 }
 0x23b   : > { %4070 = vmatpush3.bf16.xpose.msra.mxu1 %v4069_v59 }
 0x23c   : > { %4071 = vmatprep.subr.bf16.mxu1 %v4887_v0 }
 0x23d   : > { %4094 = vmatpush3.bf16.xpose.msra.mxu0 %v4093_v60 }
 0x23e   : > { %4095 = vmatprep.subr.bf16.mxu0 %v4887_v0 }
 0x243   : > { %4073 = vmatpush3.bf16.xpose.msra.mxu1 %v4072_v2 }
 0x244   : > { %4098 = vmatprep.subr.bf16.mxu1 %v4887_v0 }
 0x245   : > { %4097 = vmatpush3.bf16.xpose.msra.mxu0 %v4096_v3 }
 0x246   : > { %4122 = vmatprep.subr.bf16.mxu0 %v4887_v0 }
 0x24a   : > { %3471 = vmatmul.mubr.f32.vlgmr.msra.gmra.mrb[6].mxu1 %v5269_v31 }
 0x24b   : > { %4100 = vmatpush3.bf16.xpose.msra.mxu1 %v4099_v8  ;;  %3540 = vmatprep.mubr.msk.f32.mxu1 %vm4888_vm0, %v4886_v9 }
 0x24c   : > { %3506 = vmatmul.mubr.f32.vlgmr.msra.gmra.mrb[8].mxu0 %v5278_v36  ;;  %4101 = vmatprep.subr.bf16.mxu1 %v4887_v0 }
 0x24d   : > { %4124 = vmatpush3.bf16.xpose.msra.mxu0 %v4123_v10  ;;  %3575 = vmatprep.mubr.msk.f32.mxu0 %vm4888_vm0, %v4886_v9 }
 0x24e   : > { %4125 = vmatprep.subr.bf16.mxu0 %v4887_v0 }
 0x253   : > { %4103 = vmatpush3.bf16.xpose.msra.mxu1 %v4102_v15 }
 0x254   : > { %4104 = vmatprep.subr.bf16.mxu1 %v4887_v0 }
 0x255   : > { %4127 = vmatpush3.bf16.xpose.msra.mxu0 %v4126_v16 }
 0x256   : > { %4128 = vmatprep.subr.bf16.mxu0 %v4887_v0 }
 0x25b   : > { %4106 = vmatpush3.bf16.xpose.msra.mxu1 %v4105_v22 }
 0x25c   : > { %4107 = vmatprep.subr.bf16.mxu1 %v4887_v0 }
 0x25d   : > { %4130 = vmatpush3.bf16.xpose.msra.mxu0 %v4129_v23 }
 0x25e   : > { %4131 = vmatprep.subr.bf16.mxu0 %v4887_v0 }
 0x263   : > { %4109 = vmatpush3.bf16.xpose.msra.mxu1 %v4108_v28 }
 0x264   : > { %4110 = vmatprep.subr.bf16.mxu1 %v4887_v0 }
 0x265   : > { %4133 = vmatpush3.bf16.xpose.msra.mxu0 %v4132_v29 }
 0x266   : > { %4134 = vmatprep.subr.bf16.mxu0 %v4887_v0 }
 0x26b   : > { %4112 = vmatpush3.bf16.xpose.msra.mxu1 %v4111_v37 }
 0x26c   : > { %4113 = vmatprep.subr.bf16.mxu1 %v4887_v0 }
 0x26d   : > { %4136 = vmatpush3.bf16.xpose.msra.mxu0 %v4135_v38 }
 0x26e   : > { %4137 = vmatprep.subr.bf16.mxu0 %v4887_v0 }
 0x273   : > { %4115 = vmatpush3.bf16.xpose.msra.mxu1 %v4114_v43 }
 0x274   : > { %4116 = vmatprep.subr.bf16.mxu1 %v4887_v0 }
 0x275   : > { %4139 = vmatpush3.bf16.xpose.msra.mxu0 %v4138_v44 }
 0x276   : > { %4140 = vmatprep.subr.bf16.mxu0 %v4887_v0 }
 0x27b   : > { %4118 = vmatpush3.bf16.xpose.msra.mxu1 %v4117_v48 }
 0x27c   : > { %4119 = vmatprep.subr.bf16.mxu1 %v4887_v0 }
 0x27d   : > { %4142 = vmatpush3.bf16.xpose.msra.mxu0 %v4141_v49 }
 0x27e   : > { %4143 = vmatprep.subr.bf16.mxu0 %v4887_v0 }
 0x283   : > { %4121 = vmatpush3.bf16.xpose.msra.mxu1 %v4120_v54  ;;  %v1800_v54 = vld [vmem:[#allocation9 + $0x80] sm:$0xff] }
 0x284   : > { %4146 = vmatprep.subr.bf16.mxu1 %v4887_v0 }
 0x285   : > { %4145 = vmatpush3.bf16.xpose.msra.mxu0 %v4144_v55  ;;  %v4147_v55 = vpack.c.bf16 %v1785_v53, %v1784_v52 }
 0x286   : > { %4170 = vmatprep.subr.bf16.mxu0 %v4887_v0 }
 0x28a   : > { %3541 = vmatmul.mubr.f32.vlgmr.msra.gmra.mrb[8].mxu1 %v931_v56  ;;  %v1801_v56 = vld [vmem:[#allocation9 + $0x88] sm:$0xff] }
 0x28b   : > { %3610 = vmatprep.mubr.msk.f32.mxu1 %vm4888_vm0, %v4886_v9  ;;  %4148 = vmatpush3.bf16.msra.mxu1 %v4147_v55 }
 0x28c   : > { %3576 = vmatmul.mubr.f32.vlgmr.msra.gmra.mrb[10].mxu0 %v933_v57  ;;  %v1786_v57 = vld [vmem:[#allocation9 + $0x10] sm:$0xff]  ;;  %4149 = vmatprep.subr.bf16.mxu1 %v4887_v0 }
 0x28d   : > { %3645 = vmatprep.mubr.msk.f32.mxu0 %vm4888_vm0, %v4886_v9 }
 0x29d   : > { %v1136_v58 = vpop.f32.mrb[2].mxu1 }
 0x29e   : > { %v3332_v59 = vpop.f32.mrb[3].mxu1  ;;  %v1630_v12 = vmul.f32 0.25, %v1136_v58  ;;  %v1787_v58 = vld [vmem:[#allocation9 + $0x18] sm:$0xff] }
 0x29f   : > { %v1206_v60 = vpop.f32.mrb[4].mxu0  ;;  %v4171_v59 = vpack.c.bf16 %v1801_v56, %v1800_v54 }
 0x2a0   : > { %v3367_v61 = vpop.f32.mrb[5].mxu0  ;;  %v1631_v36 = vmul.f32 0.25, %v1206_v60  ;;  %v1638_v20 = vmax.f32 %v1630_v12, 0.0  ;;  %v1802_v60 = vld [vmem:[#allocation9 + $0x90] sm:$0xff]  ;;  %v1792_v12 = vld [vmem:[#allocation9 + $0x40] sm:$0xff] }
 0x2a1   : > { %v1803_v61 = vld [vmem:[#allocation9 + $0x98] sm:$0xff]  ;;  %4172 = vmatpush3.bf16.msra.mxu0 %v4171_v59 }
 0x2a2   : > { %v1639_v7 = vmax.f32 %v1631_v36, 0.0  ;;  %v5364_v26 = vadd.f32 %v3014_v13, %v1638_v20  ;;  %4173 = vmatprep.subr.bf16.mxu0 %v4887_v0  ;;  %v1790_v36 = vld [vmem:[#allocation9 + $0x30] sm:$0xff] }
 0x2a4   : > { %v5354_v14 = vadd.f32 %v3014_v13, %v1639_v7  ;;  %v1806_v7 = vld [vmem:[#allocation9 + $0xb0] sm:$0xff] }
 0x2a6   : > { %v1669_v21 = vrot.slane %v5354_v14, 7 }
 0x2a8   : > { %v1671_v27 = vsel %vm1670_vm1, %v1669_v21, %v5364_v26 }
 0x2dd   : > { %v1276_v62 = vpop.f32.mrb[4].mxu1 }
 0x2de   : > { %v3402_v63 = vpop.f32.mrb[5].mxu1  ;;  %v1632_v6 = vmul.f32 0.25, %v1276_v62  ;;  %v4150_v62 = vpack.c.bf16 %v1787_v58, %v1786_v57 }
 0x2df   : > { %v1346_v1 = vpop.f32.mrb[6].mxu0  ;;  %v4174_v63 = vpack.c.bf16 %v1803_v61, %v1802_v60 }
 0x2e0   : > { %v3437_v2 = vpop.f32.mrb[7].mxu0  ;;  %v1633_v8 = vmul.f32 0.25, %v1346_v1  ;;  %v1640_v10 = vmax.f32 %v1632_v6, 0.0  ;;  %v1788_v1 = vld [vmem:[#allocation9 + $0x20] sm:$0xff]  ;;  %4151 = vmatpush3.bf16.msra.mxu1 %v4150_v62  ;;  %v1791_v6 = vld [vmem:[#allocation9 + $0x38] sm:$0xff] }
 0x2e1   : > { %v1789_v2 = vld [vmem:[#allocation9 + $0x28] sm:$0xff]  ;;  %4175 = vmatpush3.bf16.msra.mxu0 %v4174_v63  ;;  %4152 = vmatprep.subr.bf16.mxu1 %v4887_v0 }
 0x2e2   : > { %v1641_v15 = vmax.f32 %v1633_v8, 0.0  ;;  %v5356_v17 = vadd.f32 %v3014_v13, %v1640_v10  ;;  %4176 = vmatprep.subr.bf16.mxu0 %v4887_v0  ;;  %v1807_v8 = vld [vmem:[#allocation9 + $0xb8] sm:$0xff]  ;;  %v4156_v10 = vpack.c.bf16 %v1791_v6, %v1790_v36 }
 0x2e3   : > { %v1811_v6 = vld [vmem:[#allocation9 + $0xd8] sm:$0xff] }
 0x2e4   : > { %v5359_v22 = vadd.f32 %v3014_v13, %v1641_v15  ;;  %v1672_v24 = vrot.slane %v5356_v17, 6  ;;  %v1808_v15 = vld [vmem:[#allocation9 + $0xc0] sm:$0xff] }
 0x2e6   : > { %v1675_v28 = vrot.slane %v5359_v22, 5  ;;  %v1674_v33 = vsel %vm1673_vm2, %v1672_v24, %v1671_v27 }
 0x2e8   : > { %v1677_v43 = vsel %vm1676_vm3, %v1675_v28, %v1674_v33 }
 0x31d   : > { %v1416_v31 = vpop.f32.mrb[6].mxu1 }
 0x31e   : > { %v3472_v3 = vpop.f32.mrb[7].mxu1  ;;  %v1634_v11 = vmul.f32 0.25, %v1416_v31  ;;  %v1804_v31 = vld [vmem:[#allocation9 + $0xa0] sm:$0xff] }
 0x31f   : > { %v1486_v4 = vpop.f32.mrb[8].mxu0  ;;  %v1805_v3 = vld [vmem:[#allocation9 + $0xa8] sm:$0xff] }
 0x320   : > { %v3507_v5 = vpop.f32.mrb[9].mxu0  ;;  %v1635_v16 = vmul.f32 0.25, %v1486_v4  ;;  %v1642_v19 = vmax.f32 %v1634_v11, 0.0  ;;  %v4153_v4 = vpack.c.bf16 %v1789_v2, %v1788_v1  ;;  %v4180_v11 = vpack.c.bf16 %v1807_v8, %v1806_v7  ;;  %v1796_v7 = vld [vmem:[#allocation9 + $0x60] sm:$0xff]  ;;  %v1797_v8 = vld [vmem:[#allocation9 + $0x68] sm:$0xff] }
 0x321   : > { %v4177_v5 = vpack.c.bf16 %v1805_v3, %v1804_v31  ;;  %v1794_v3 = vld [vmem:[#allocation9 + $0x50] sm:$0xff] }
 0x322   : > { %v1643_v23 = vmax.f32 %v1635_v16, 0.0  ;;  %v5362_v25 = vadd.f32 %v3014_v13, %v1642_v19  ;;  %4154 = vmatpush3.bf16.msra.mxu1 %v4153_v4  ;;  %v1809_v16 = vld [vmem:[#allocation9 + $0xc8] sm:$0xff]  ;;  %v1795_v4 = vld [vmem:[#allocation9 + $0x58] sm:$0xff] }
 0x323   : > { %4178 = vmatpush3.bf16.msra.mxu0 %v4177_v5  ;;  %4155 = vmatprep.subr.bf16.mxu1 %v4887_v0  ;;  %v4183_v20 = vpack.c.bf16 %v1809_v16, %v1808_v15  ;;  %v1810_v5 = vld [vmem:[#allocation9 + $0xd0] sm:$0xff]  ;;  %v4162_v36 = vpack.c.bf16 %v1795_v4, %v1794_v3 }
 0x324   : > { %v5369_v29 = vadd.f32 %v3014_v13, %v1643_v23  ;;  %v1678_v34 = vrot.slane %v5362_v25, 4  ;;  %4179 = vmatprep.subr.bf16.mxu0 %v4887_v0  ;;  %v1798_v16 = vld [vmem:[#allocation9 + $0x70] sm:$0xff] }
 0x326   : > { %v1681_v42 = vrot.slane %v5369_v29, 3  ;;  %v1680_v45 = vsel %vm1679_vm4, %v1678_v34, %v1677_v43  ;;  %4157 = vmatpush3.bf16.msra.mxu1 %v4156_v10  ;;  %v4186_v10 = vpack.c.bf16 %v1811_v6, %v1810_v5  ;;  %v1838_v6 = vld [vmem:[#allocation9 + $0x1b0] sm:$0xff] }
 0x327   : > { %4181 = vmatpush3.bf16.msra.mxu0 %v4180_v11  ;;  %4158 = vmatprep.subr.bf16.mxu1 %v4887_v0  ;;  %v1812_v11 = vld [vmem:[#allocation9 + $0xe0] sm:$0xff] }
 0x328   : > { %v1683_v48 = vsel %vm1682_vm5, %v1681_v42, %v1680_v45  ;;  %4182 = vmatprep.subr.bf16.mxu0 %v4887_v0 }
 0x32b   : > { %4184 = vmatpush3.bf16.msra.mxu0 %v4183_v20  ;;  %v1814_v20 = vld [vmem:[#allocation9 + $0xf0] sm:$0xff] }
 0x32c   : > { %4185 = vmatprep.subr.bf16.mxu0 %v4887_v0 }
 0x32f   : > { %4187 = vmatpush3.bf16.msra.mxu0 %v4186_v10 }
 0x330   : > { %4188 = vmatprep.subr.bf16.mxu0 %v4887_v0 }
 0x35d   : > { %v1556_v30 = vpop.f32.mrb[8].mxu1 }
 0x35e   : > { %v1636_v35 = vmul.f32 0.25, %v1556_v30  ;;  %v3542_v37 = vpop.f32.mrb[9].mxu1 }
 0x35f   : > { %v1626_v38 = vpop.f32.mrb[10].mxu0 }
 0x360   : > { %v1644_v39 = vmax.f32 %v1636_v35, 0.0  ;;  %v1637_v40 = vmul.f32 0.25, %v1626_v38  ;;  %v3577_v41 = vpop.f32.mrb[11].mxu0 }
 0x362   : > { %v5375_v44 = vadd.f32 %v3014_v13, %v1644_v39  ;;  %v1645_v32 = vmax.f32 %v1637_v40, 0.0 }
 0x364   : > { %v1684_v46 = vrot.slane %v5375_v44, 2  ;;  %v5379_v47 = vadd.f32 %v3014_v13, %v1645_v32  ;;  %v1793_v13 = vld [vmem:[#allocation9 + $0x48] sm:$0xff] }
 0x365   : > { %v4159_v19 = vpack.c.bf16 %v1793_v13, %v1792_v12  ;;  %v1813_v12 = vld [vmem:[#allocation9 + $0xe8] sm:$0xff]  ;;  %v4165_v13 = vpack.c.bf16 %v1797_v8, %v1796_v7  ;;  %v1839_v7 = vld [vmem:[#allocation9 + $0x1b8] sm:$0xff] }
 0x366   : > { %v1686_v49 = vsel %vm1685_vm6, %v1684_v46, %v1683_v48  ;;  %v1687_v50 = vrot.slane %v5379_v47, 1  ;;  %v4189_v15 = vpack.c.bf16 %v1813_v12, %v1812_v11 }
 0x367   : > { %4160 = vmatpush3.bf16.msra.mxu1 %v4159_v19  ;;  %v1799_v19 = vld [vmem:[#allocation9 + $0x78] sm:$0xff] }
 0x368   : > { %v1689_v51 = vsel %vm1688_vm7, %v1687_v50, %v1686_v49  ;;  %4161 = vmatprep.subr.bf16.mxu1 %v4887_v0  ;;  %4190 = vmatpush3.bf16.msra.mxu0 %v4189_v15  ;;  %v1825_v15 = vld [vmem:[#allocation9 + $0x148] sm:$0xff] }
 0x369   : > { %1691 = vmax.xlane.f32.xlu0 %v1689_v51  ;;  %4191 = vmatprep.subr.bf16.mxu0 %v4887_v0 }
 0x36b   : > { %4163 = vmatpush3.bf16.msra.mxu1 %v4162_v36 }
 0x36c   : > { %4164 = vmatprep.subr.bf16.mxu1 %v4887_v0 }
 0x36f   : > { %4166 = vmatpush3.bf16.msra.mxu1 %v4165_v13  ;;  %v1824_v13 = vld [vmem:[#allocation9 + $0x140] sm:$0xff] }
 0x370   : > { %4167 = vmatprep.subr.bf16.mxu1 %v4887_v0 }
 0x3f6   : > { %v1692_v21 = vpop.xlane.xlu0 %1691 }
 0x3f7   : > { %v1694_v23 = vrot.slane %v1692_v21, 1  ;;  %v1695_v24 = vrot.slane %v1692_v21, 2  ;;  %v1696_v27 = vrot.slane %v1692_v21, 3  ;;  %v1697_v28 = vrot.slane %v1692_v21, 4 }
 0x3f8   : > { %v1698_v30 = vrot.slane %v1692_v21, 5  ;;  %v1699_v33 = vrot.slane %v1692_v21, 6  ;;  %v1709_v34 = vsub.f32 %v5364_v26, %v1692_v21  ;;  %v1700_v35 = vrot.slane %v1692_v21, 7  ;;  %v1815_v21 = vld [vmem:[#allocation9 + $0xf8] sm:$0xff] }
 0x3f9   : > { %v1710_v37 = vsub.f32 %v5354_v14, %v1694_v23  ;;  %v1711_v38 = vsub.f32 %v5356_v17, %v1695_v24  ;;  %v1712_v39 = vsub.f32 %v5359_v22, %v1696_v27  ;;  %v1713_v40 = vsub.f32 %v5362_v25, %v1697_v28  ;;  %v1816_v28 = vld [vmem:[#allocation9 + $0x100] sm:$0xff] }
 0x3fa   : > { %v1717_v41 = vmul.f32 1.442695, %v1709_v34  ;;  %v1714_v42 = vsub.f32 %v5369_v29, %v1698_v30  ;;  %v1715_v43 = vsub.f32 %v5375_v44, %v1699_v33  ;;  %v1716_v48 = vsub.f32 %v5379_v47, %v1700_v35  ;;  %v1817_v30 = vld [vmem:[#allocation9 + $0x108] sm:$0xff]  ;;  %v1832_v33 = vld [vmem:[#allocation9 + $0x180] sm:$0xff] }
 0x3fb   : > { %v1719_v32 = vmul.f32 1.442695, %v1710_v37  ;;  %v1721_v45 = vmul.f32 1.442695, %v1711_v38  ;;  %v1723_v46 = vmul.f32 1.442695, %v1712_v39  ;;  %v4168_v23 = vpack.c.bf16 %v1799_v19, %v1798_v16 }
 0x3fc   : > { %4538 = vpow2.f32 %v1717_v41  ;;  %v1725_v26 = vmul.f32 1.442695, %v1713_v40  ;;  %v1727_v14 = vmul.f32 1.442695, %v1714_v42  ;;  %v1729_v17 = vmul.f32 1.442695, %v1715_v43 }
 0x3fd   : > { %4540 = vpow2.f32 %v1719_v32  ;;  %v1731_v22 = vmul.f32 1.442695, %v1716_v48  ;;  %v4192_v24 = vpack.c.bf16 %v1815_v21, %v1814_v20  ;;  %4169 = vmatpush3.bf16.msra.mxu1 %v4168_v23  ;;  %v1833_v34 = vld [vmem:[#allocation9 + $0x188] sm:$0xff]  ;;  %v4195_v37 = vpack.c.bf16 %v1817_v30, %v1816_v28  ;;  %v1818_v40 = vld [vmem:[#allocation9 + $0x110] sm:$0xff]  ;;  %v1819_v41 = vld [vmem:[#allocation9 + $0x118] sm:$0xff] }
 0x3fe   : > { %4542 = vpow2.f32 %v1721_v45  ;;  %4194 = vmatprep.subr.bf16.mxu1 %v4887_v0  ;;  %v4219_v32 = vpack.c.bf16 %v1833_v34, %v1832_v33  ;;  %v4228_v19 = vpack.c.bf16 %v1839_v7, %v1838_v6  ;;  %v1840_v20 = vld [vmem:[#allocation9 + $0x1c0] sm:$0xff]  ;;  %v1841_v21 = vld [vmem:[#allocation9 + $0x1c8] sm:$0xff]  ;;  %v4207_v23 = vpack.c.bf16 %v1825_v15, %v1824_v13  ;;  %v1842_v30 = vld [vmem:[#allocation9 + $0x1d0] sm:$0xff] }
 0x3ff   : > { %4544 = vpow2.f32 %v1723_v46  ;;  %4193 = vmatpush3.bf16.msra.mxu0 %v4192_v24  ;;  %v1826_v24 = vld [vmem:[#allocation9 + $0x150] sm:$0xff]  ;;  %v4231_v28 = vpack.c.bf16 %v1841_v21, %v1840_v20  ;;  %v1843_v33 = vld [vmem:[#allocation9 + $0x1d8] sm:$0xff]  ;;  %v1872_v7 = vld [vmem:[#allocation9 + $0x2c0] sm:$0xff] }
 0x400   : > { %4546 = vpow2.f32 %v1725_v26  ;;  %4218 = vmatprep.subr.bf16.mxu0 %v4887_v0  ;;  %v1874_v15 = vld [vmem:[#allocation9 + $0x2d0] sm:$0xff]  ;;  %v1860_v20 = vld [vmem:[#allocation9 + $0x260] sm:$0xff]  ;;  %v1861_v21 = vld [vmem:[#allocation9 + $0x268] sm:$0xff] }
 0x401   : > { %4548 = vpow2.f32 %v1727_v14  ;;  %v1834_v14 = vld [vmem:[#allocation9 + $0x190] sm:$0xff] }
 0x402   : > { %4550 = vpow2.f32 %v1729_v17  ;;  %v1835_v17 = vld [vmem:[#allocation9 + $0x198] sm:$0xff] }
 0x403   : > { %4552 = vpow2.f32 %v1731_v22 }
 0x406   : > { %v4539_v25 = vpop.eup %4538 }
 0x407   : > { %v5403_v29 = vpop.eup %4540 }
 0x408   : > { %v5405_v44 = vpop.eup %4542  ;;  %v1741_v49 = vrot.slane %v5403_v29, 7 }
 0x409   : > { %v5408_v47 = vpop.eup %4544  ;;  %v1743_v50 = vrot.slane %v5405_v44, 6 }
 0x40a   : > { %v5411_v51 = vpop.eup %4546  ;;  %v1742_v52 = vsel %vm1670_vm1, %v1741_v49, %v4539_v25  ;;  %v1745_v53 = vrot.slane %v5408_v47, 5 }
 0x40b   : > { %v5415_v54 = vpop.eup %4548  ;;  %v1744_v55 = vsel %vm1673_vm2, %v1743_v50, %v1742_v52  ;;  %v1747_v56 = vrot.slane %v5411_v51, 4  ;;  %v4198_v50 = vpack.c.bf16 %v1819_v41, %v1818_v40  ;;  %v1845_v40 = vld [vmem:[#allocation9 + $0x1e8] sm:$0xff] }
 0x40c   : > { %v5419_v57 = vpop.eup %4550  ;;  %v1746_v58 = vsel %vm1676_vm3, %v1745_v53, %v1744_v55  ;;  %v1749_v59 = vrot.slane %v5415_v54, 3  ;;  %v1821_v55 = vld [vmem:[#allocation9 + $0x128] sm:$0xff] }
 0x40d   : > { %v5423_v60 = vpop.eup %4552  ;;  %v1748_v61 = vsel %vm1679_vm4, %v1747_v56, %v1746_v58  ;;  %v1751_v62 = vrot.slane %v5419_v57, 2  ;;  %v4222_v56 = vpack.c.bf16 %v1835_v17, %v1834_v14  ;;  %v1849_v14 = vld [vmem:[#allocation9 + $0x208] sm:$0xff] }
 0x40e   : > { %v1750_v63 = vsel %vm1682_vm5, %v1749_v59, %v1748_v61  ;;  %v1753_v1 = vrot.slane %v5423_v60, 1  ;;  %v1836_v59 = vld [vmem:[#allocation9 + $0x1a0] sm:$0xff]  ;;  %v1837_v61 = vld [vmem:[#allocation9 + $0x1a8] sm:$0xff] }
 0x40f   : > { %v1752_v2 = vsel %vm1685_vm6, %v1751_v62, %v1750_v63  ;;  %v4225_v5 = vpack.c.bf16 %v1837_v61, %v1836_v59  ;;  %v1852_v61 = vld [vmem:[#allocation9 + $0x220] sm:$0xff] }
 0x410   : > { %v1754_v31 = vsel %vm1688_vm7, %v1753_v1, %v1752_v2 }
 0x411   : > { %1756 = vadd.xlane.f32.xlu0 %v1754_v31  ;;  %v1823_v31 = vld [vmem:[#allocation9 + $0x138] sm:$0xff] }
 0x49e   : > { %v1757_v27 = vpop.xlane.xlu0 %1756 }
 0x49f   : > { %4554 = vrcp.f32 %v1757_v27  ;;  %v1827_v27 = vld [vmem:[#allocation9 + $0x158] sm:$0xff] }
 0x4a0   : > { %v4210_v34 = vpack.c.bf16 %v1827_v27, %v1826_v24  ;;  %v1876_v24 = vld [vmem:[#allocation9 + $0x2e0] sm:$0xff]  ;;  %v1877_v27 = vld [vmem:[#allocation9 + $0x2e8] sm:$0xff] }
 0x4a9   : > { %v4555_v35 = vpop.eup %4554 }
 0x4aa   : > { %v1776_v38 = vmul.f32 %v4555_v35, %v4539_v25  ;;  %v1761_v39 = vrot.slane %v4555_v35, 1  ;;  %v1762_v42 = vrot.slane %v4555_v35, 2  ;;  %v1763_v43 = vrot.slane %v4555_v35, 3 }
 0x4ab   : > { %v1764_v45 = vrot.slane %v4555_v35, 4  ;;  %v1765_v46 = vrot.slane %v4555_v35, 5  ;;  %v1766_v48 = vrot.slane %v4555_v35, 6  ;;  %v1767_v25 = vrot.slane %v4555_v35, 7  ;;  %v1828_v35 = vld [vmem:[#allocation9 + $0x160] sm:$0xff] }
 0x4ac   : > { %3611 = vmatmul.mubr.f32.vlgmr.msra.gmra.mrb[10].mxu1 %v1776_v38  ;;  %v1777_v26 = vmul.f32 %v5403_v29, %v1761_v39  ;;  %v5439_v22 = vmul.f32 %v5405_v44, %v1762_v42  ;;  %v5442_v49 = vmul.f32 %v5408_v47, %v1763_v43  ;;  %v1820_v29 = vld [vmem:[#allocation9 + $0x120] sm:$0xff]  ;;  %v1830_v42 = vld [vmem:[#allocation9 + $0x170] sm:$0xff]  ;;  %v1831_v43 = vld [vmem:[#allocation9 + $0x178] sm:$0xff] }
 0x4ad   : > { %4196 = vmatpush3.bf16.msra.mxu1 %v4195_v37  ;;  %3680 = vmatprep.mubr.msk.f32.mxu1 %vm4888_vm0, %v4886_v9  ;;  %v5447_v52 = vmul.f32 %v5411_v51, %v1764_v45  ;;  %v5452_v47 = vmul.f32 %v5415_v54, %v1765_v46  ;;  %v5457_v58 = vmul.f32 %v5419_v57, %v1766_v48  ;;  %v1822_v57 = vld [vmem:[#allocation9 + $0x130] sm:$0xff]  ;;  %v1829_v37 = vld [vmem:[#allocation9 + $0x168] sm:$0xff]  ;;  %v1844_v39 = vld [vmem:[#allocation9 + $0x1e0] sm:$0xff] }
 0x4ae   : > { %3646 = vmatmul.mubr.f32.vlgmr.msra.gmra.mrb[12].mxu0 %v1777_v26  ;;  %v2755_v53 = vrot.slane %v1777_v26, 7  ;;  %4197 = vmatprep.subr.bf16.mxu1 %v4887_v0  ;;  %v2757_v44 = vrot.slane %v5439_v22, 6  ;;  %v2759_v62 = vrot.slane %v5442_v49, 5  ;;  %v5463_v63 = vmul.f32 %v5423_v60, %v1767_v25  ;;  %v1846_v45 = vld [vmem:[#allocation9 + $0x1f0] sm:$0xff]  ;;  %v1847_v46 = vld [vmem:[#allocation9 + $0x1f8] sm:$0xff]  ;;  %v1848_v26 = vld [vmem:[#allocation9 + $0x200] sm:$0xff] }
 0x4af   : > { %4220 = vmatpush3.bf16.msra.mxu0 %v4219_v32  ;;  %3715 = vmatprep.mubr.msk.f32.mxu0 %vm4888_vm0, %v4886_v9  ;;  %v4201_v54 = vpack.c.bf16 %v1821_v55, %v1820_v29  ;;  %v2761_v2 = vrot.slane %v5447_v52, 4  ;;  %v2763_v3 = vrot.slane %v5452_v47, 3  ;;  %v2765_v36 = vrot.slane %v5457_v58, 2  ;;  %v1864_v25 = vld [vmem:[#allocation9 + $0x280] sm:$0xff]  ;;  %v1850_v29 = vld [vmem:[#allocation9 + $0x210] sm:$0xff]  ;;  %v1851_v55 = vld [vmem:[#allocation9 + $0x218] sm:$0xff] }
 0x4b0   : > { %v2756_v51 = vsel %vm1670_vm1, %v2755_v53, %v1776_v38  ;;  %4221 = vmatprep.subr.bf16.mxu0 %v4887_v0  ;;  %v2767_v10 = vrot.slane %v5463_v63, 1  ;;  %v4204_v11 = vpack.c.bf16 %v1823_v31, %v1822_v57  ;;  %v4234_v38 = vpack.c.bf16 %v1843_v33, %v1842_v30  ;;  %v1854_v57 = vld [vmem:[#allocation9 + $0x230] sm:$0xff]  ;;  %v1855_v31 = vld [vmem:[#allocation9 + $0x238] sm:$0xff] }
 0x4b1   : > { %4199 = vmatpush3.bf16.msra.mxu1 %v4198_v50  ;;  %v2758_v1 = vsel %vm1673_vm2, %v2757_v44, %v2756_v51  ;;  %v4213_v41 = vpack.c.bf16 %v1829_v37, %v1828_v35  ;;  %v4237_v32 = vpack.c.bf16 %v1845_v40, %v1844_v39  ;;  %v4216_v48 = vpack.c.bf16 %v1831_v43, %v1830_v42  ;;  %v1865_v50 = vld [vmem:[#allocation9 + $0x288] sm:$0xff]  ;;  %v1867_v51 = vld [vmem:[#allocation9 + $0x298] sm:$0xff]  ;;  %v1862_v30 = vld [vmem:[#allocation9 + $0x270] sm:$0xff] }
 0x4b2   : > { %4200 = vmatprep.subr.bf16.mxu1 %v4887_v0  ;;  %v2760_v4 = vsel %vm1676_vm3, %v2759_v62, %v2758_v1  ;;  %v4240_v17 = vpack.c.bf16 %v1847_v46, %v1846_v45  ;;  %v4243_v53 = vpack.c.bf16 %v1849_v14, %v1848_v26  ;;  %v4267_v44 = vpack.c.bf16 %v1865_v50, %v1864_v25  ;;  %v1853_v62 = vld [vmem:[#allocation9 + $0x228] sm:$0xff]  ;;  %v1863_v33 = vld [vmem:[#allocation9 + $0x278] sm:$0xff]  ;;  %v1878_v35 = vld [vmem:[#allocation9 + $0x2f0] sm:$0xff] }
 0x4b3   : > { %4223 = vmatpush3.bf16.msra.mxu0 %v4222_v56  ;;  %v2762_v60 = vsel %vm1679_vm4, %v2761_v2, %v2760_v4  ;;  %v1866_v56 = vld [vmem:[#allocation9 + $0x290] sm:$0xff]  ;;  %v4246_v59 = vpack.c.bf16 %v1851_v55, %v1850_v29  ;;  %v1869_v1 = vld [vmem:[#allocation9 + $0x2a8] sm:$0xff]  ;;  %v4249_v2 = vpack.c.bf16 %v1853_v62, %v1852_v61  ;;  %v1871_v4 = vld [vmem:[#allocation9 + $0x2b8] sm:$0xff] }
 0x4b4   : > { %4224 = vmatprep.subr.bf16.mxu0 %v4887_v0  ;;  %v2764_v8 = vsel %vm1682_vm5, %v2763_v3, %v2762_v60  ;;  %v1870_v3 = vld [vmem:[#allocation9 + $0x2b0] sm:$0xff]  ;;  %v1857_v60 = vld [vmem:[#allocation9 + $0x248] sm:$0xff]  ;;  %v1879_v37 = vld [vmem:[#allocation9 + $0x2f8] sm:$0xff] }
 0x4b5   : > { %4202 = vmatpush3.bf16.msra.mxu1 %v4201_v54  ;;  %v2766_v12 = vsel %vm1685_vm6, %v2765_v36, %v2764_v8  ;;  %v4270_v54 = vpack.c.bf16 %v1867_v51, %v1866_v56  ;;  %v1856_v36 = vld [vmem:[#allocation9 + $0x240] sm:$0xff]  ;;  %v4276_v6 = vpack.c.bf16 %v1871_v4, %v1870_v3  ;;  %v1873_v8 = vld [vmem:[#allocation9 + $0x2c8] sm:$0xff]  ;;  %v1882_v45 = vld [vmem:[#allocation9 + $0x310] sm:$0xff] }
 0x4b6   : > { %4203 = vmatprep.subr.bf16.mxu1 %v4887_v0  ;;  %v2768_v16 = vsel %vm1688_vm7, %v2767_v10, %v2766_v12  ;;  %v4255_v10 = vpack.c.bf16 %v1857_v60, %v1856_v36  ;;  %v1859_v12 = vld [vmem:[#allocation9 + $0x258] sm:$0xff]  ;;  %v4279_v13 = vpack.c.bf16 %v1873_v8, %v1872_v7  ;;  %v1880_v39 = vld [vmem:[#allocation9 + $0x300] sm:$0xff]  ;;  %v1881_v40 = vld [vmem:[#allocation9 + $0x308] sm:$0xff] }
 0x4b7   : > { %4226 = vmatpush3.bf16.msra.mxu0 %v4225_v5  ;;  %2770 = vst [vmem:[%s5226_s30] sm:$0xff] %v2768_v16  ;;  %v4252_v5 = vpack.c.bf16 %v1855_v31, %v1854_v57  ;;  %v1875_v16 = vld [vmem:[#allocation9 + $0x2d8] sm:$0xff]  ;;  %v1896_v42 = vld [vmem:[#allocation9 + $0x380] sm:$0xff]  ;;  %v1897_v43 = vld [vmem:[#allocation9 + $0x388] sm:$0xff] }
 0x4b8   : > { %4227 = vmatprep.subr.bf16.mxu0 %v4887_v0  ;;  %v1883_v46 = vld [vmem:[#allocation9 + $0x318] sm:$0xff]  ;;  %v1898_v26 = vld [vmem:[#allocation9 + $0x390] sm:$0xff]  ;;  %v1884_v25 = vld [vmem:[#allocation9 + $0x320] sm:$0xff] }
 0x4b9   : > { %4205 = vmatpush3.bf16.msra.mxu1 %v4204_v11  ;;  %v1858_v11 = vld [vmem:[#allocation9 + $0x250] sm:$0xff]  ;;  %v1899_v14 = vld [vmem:[#allocation9 + $0x398] sm:$0xff]  ;;  %v1885_v50 = vld [vmem:[#allocation9 + $0x328] sm:$0xff] }
 0x4ba   : > { %4206 = vmatprep.subr.bf16.mxu1 %v4887_v0  ;;  %v1901_v29 = vld [vmem:[#allocation9 + $0x3a8] sm:$0xff]  ;;  %v4297_v55 = vpack.c.bf16 %v1885_v50, %v1884_v25  ;;  %v1887_v56 = vld [vmem:[#allocation9 + $0x338] sm:$0xff]  ;;  %v1902_v51 = vld [vmem:[#allocation9 + $0x3b0] sm:$0xff] }
 0x4bb   : > { %4229 = vmatpush3.bf16.msra.mxu0 %v4228_v19  ;;  %v4258_v19 = vpack.c.bf16 %v1859_v12, %v1858_v11  ;;  %v1888_v62 = vld [vmem:[#allocation9 + $0x340] sm:$0xff]  ;;  %v1890_v31 = vld [vmem:[#allocation9 + $0x350] sm:$0xff] }
 0x4bc   : > { %4230 = vmatprep.subr.bf16.mxu0 %v4887_v0  ;;  %v1906_v4 = vld [vmem:[#allocation9 + $0x3d0] sm:$0xff]  ;;  %v1892_v60 = vld [vmem:[#allocation9 + $0x360] sm:$0xff] }
 0x4bd   : > { %4208 = vmatpush3.bf16.msra.mxu1 %v4207_v23  ;;  %v4282_v23 = vpack.c.bf16 %v1875_v16, %v1874_v15  ;;  %v1908_v8 = vld [vmem:[#allocation9 + $0x3e0] sm:$0xff]  ;;  %v1894_v12 = vld [vmem:[#allocation9 + $0x370] sm:$0xff] }
 0x4be   : > { %4209 = vmatprep.subr.bf16.mxu1 %v4887_v0  ;;  %v1910_v16 = vld [vmem:[#allocation9 + $0x3f0] sm:$0xff]  ;;  %v2525_v50 = vld [vmem:[#allocation13 + $0x98] sm:$0xff] }
 0x4bf   : > { %4232 = vmatpush3.bf16.msra.mxu0 %v4231_v28  ;;  %v4261_v28 = vpack.c.bf16 %v1861_v21, %v1860_v20 }
 0x4c0   : > { %4233 = vmatprep.subr.bf16.mxu0 %v4887_v0 }
 0x4c1   : > { %4211 = vmatpush3.bf16.msra.mxu1 %v4210_v34  ;;  %v4285_v34 = vpack.c.bf16 %v1877_v27, %v1876_v24  ;;  %v2511_v24 = vld [vmem:[#allocation13 + $0x28] sm:$0xff]  ;;  %v2509_v27 = vld [vmem:[#allocation13 + $0x18] sm:$0xff] }
 0x4c2   : > { %4212 = vmatprep.subr.bf16.mxu1 %v4887_v0 }
 0x4c3   : > { %4235 = vmatpush3.bf16.msra.mxu0 %v4234_v38  ;;  %v4264_v38 = vpack.c.bf16 %v1863_v33, %v1862_v30  ;;  %v2513_v30 = vld [vmem:[#allocation13 + $0x38] sm:$0xff]  ;;  %v2506_v33 = vld [vmem:[#allocation13] sm:$0xff] }
 0x4c4   : > { %4236 = vmatprep.subr.bf16.mxu0 %v4887_v0 }
 0x4c5   : > { %4214 = vmatpush3.bf16.msra.mxu1 %v4213_v41  ;;  %v4288_v41 = vpack.c.bf16 %v1879_v37, %v1878_v35  ;;  %v4370_v35 = vpack.c.bf16 %v2513_v30, %v2509_v27  ;;  %v2546_v27 = vld [vmem:[#allocation13 + $0x140] sm:$0xff] }
 0x4c6   : > { %4215 = vmatprep.subr.bf16.mxu1 %v4887_v0 }
 0x4c7   : > { %4238 = vmatpush3.bf16.msra.mxu0 %v4237_v32  ;;  %v4291_v32 = vpack.c.bf16 %v1881_v40, %v1880_v39  ;;  %v2515_v39 = vld [vmem:[#allocation13 + $0x48] sm:$0xff] }
 0x4c8   : > { %4239 = vmatprep.subr.bf16.mxu0 %v4887_v0  ;;  %v2519_v40 = vld [vmem:[#allocation13 + $0x68] sm:$0xff] }
 0x4c9   : > { %4217 = vmatpush3.bf16.msra.mxu1 %v4216_v48  ;;  %v4315_v48 = vpack.c.bf16 %v1897_v43, %v1896_v42  ;;  %v2521_v42 = vld [vmem:[#allocation13 + $0x78] sm:$0xff]  ;;  %v2514_v43 = vld [vmem:[#allocation13 + $0x40] sm:$0xff] }
 0x4ca   : > { %4242 = vmatprep.subr.bf16.mxu1 %v4887_v0 }
 0x4cb   : > { %4241 = vmatpush3.bf16.msra.mxu0 %v4240_v17  ;;  %v4294_v17 = vpack.c.bf16 %v1883_v46, %v1882_v45  ;;  %v2516_v45 = vld [vmem:[#allocation13 + $0x50] sm:$0xff] }
 0x4cc   : > { %3681 = vmatmul.mubr.f32.vlgmr.msra.gmra.mrb[12].mxu1 %v5439_v22  ;;  %4266 = vmatprep.subr.bf16.mxu0 %v4887_v0  ;;  %v1868_v22 = vld [vmem:[#allocation9 + $0x2a0] sm:$0xff] }
 0x4cd   : > { %4244 = vmatpush3.bf16.msra.mxu1 %v4243_v53  ;;  %3750 = vmatprep.mubr.msk.f32.mxu1 %vm4888_vm0, %v4886_v9  ;;  %v4318_v53 = vpack.c.bf16 %v1899_v14, %v1898_v26  ;;  %v2523_v26 = vld [vmem:[#allocation13 + $0x88] sm:$0xff] }
 0x4ce   : > { %3716 = vmatmul.mubr.f32.vlgmr.msra.gmra.mrb[14].mxu0 %v5442_v49  ;;  %4245 = vmatprep.subr.bf16.mxu1 %v4887_v0  ;;  %v4273_v49 = vpack.c.bf16 %v1869_v1, %v1868_v22  ;;  %v1904_v1 = vld [vmem:[#allocation9 + $0x3c0] sm:$0xff]  ;;  %v2527_v14 = vld [vmem:[#allocation13 + $0xa8] sm:$0xff] }
 0x4cf   : > { %4268 = vmatpush3.bf16.msra.mxu0 %v4267_v44  ;;  %3785 = vmatprep.mubr.msk.f32.mxu0 %vm4888_vm0, %v4886_v9  ;;  %v1886_v44 = vld [vmem:[#allocation9 + $0x330] sm:$0xff]  ;;  %v4346_v25 = vpack.c.bf16 %v2527_v14, %v2523_v26  ;;  %v2565_v26 = vld [vmem:[#allocation13 + $0x1d8] sm:$0xff] }
 0x4d0   : > { %4269 = vmatprep.subr.bf16.mxu0 %v4887_v0  ;;  %v4300_v61 = vpack.c.bf16 %v1887_v56, %v1886_v44  ;;  %v2524_v44 = vld [vmem:[#allocation13 + $0x90] sm:$0xff] }
 0x4d1   : > { %4247 = vmatpush3.bf16.msra.mxu1 %v4246_v59  ;;  %v1903_v59 = vld [vmem:[#allocation9 + $0x3b8] sm:$0xff] }
 0x4d2   : > { %4248 = vmatprep.subr.bf16.mxu1 %v4887_v0  ;;  %v4324_v22 = vpack.c.bf16 %v1903_v59, %v1902_v51  ;;  %v2528_v56 = vld [vmem:[#allocation13 + $0xb0] sm:$0xff]  ;;  %v2531_v51 = vld [vmem:[#allocation13 + $0xc8] sm:$0xff] }
 0x4d3   : > { %4271 = vmatpush3.bf16.msra.mxu0 %v4270_v54  ;;  %v1889_v54 = vld [vmem:[#allocation9 + $0x348] sm:$0xff]  ;;  %v2535_v59 = vld [vmem:[#allocation13 + $0xe8] sm:$0xff] }
 0x4d4   : > { %4272 = vmatprep.subr.bf16.mxu0 %v4887_v0  ;;  %v4303_v57 = vpack.c.bf16 %v1889_v54, %v1888_v62  ;;  %v4380_v62 = vpack.c.bf16 %v2528_v56, %v2524_v44  ;;  %v4350_v54 = vpack.c.bf16 %v2535_v59, %v2531_v51 }
 0x4d5   : > { %4250 = vmatpush3.bf16.msra.mxu1 %v4249_v2  ;;  %v1905_v2 = vld [vmem:[#allocation9 + $0x3c8] sm:$0xff] }
 0x4d6   : > { %4251 = vmatprep.subr.bf16.mxu1 %v4887_v0  ;;  %v4327_v3 = vpack.c.bf16 %v1905_v2, %v1904_v1  ;;  %v2530_v1 = vld [vmem:[#allocation13 + $0xc0] sm:$0xff] }
 0x4d7   : > { %4274 = vmatpush3.bf16.msra.mxu0 %v4273_v49  ;;  %v1891_v49 = vld [vmem:[#allocation9 + $0x358] sm:$0xff]  ;;  %v2534_v2 = vld [vmem:[#allocation13 + $0xe0] sm:$0xff] }
 0x4d8   : > { %4275 = vmatprep.subr.bf16.mxu0 %v4887_v0  ;;  %v4306_v36 = vpack.c.bf16 %v1891_v49, %v1890_v31  ;;  %v2532_v31 = vld [vmem:[#allocation13 + $0xd0] sm:$0xff] }
 0x4d9   : > { %4253 = vmatpush3.bf16.msra.mxu1 %v4252_v5  ;;  %v1907_v5 = vld [vmem:[#allocation9 + $0x3d8] sm:$0xff] }
 0x4da   : > { %4254 = vmatprep.subr.bf16.mxu1 %v4887_v0  ;;  %v4330_v7 = vpack.c.bf16 %v1907_v5, %v1906_v4  ;;  %v2536_v49 = vld [vmem:[#allocation13 + $0xf0] sm:$0xff]  ;;  %v2543_v4 = vld [vmem:[#allocation13 + $0x128] sm:$0xff]  ;;  %v2541_v5 = vld [vmem:[#allocation13 + $0x118] sm:$0xff] }
 0x4db   : > { %4277 = vmatpush3.bf16.msra.mxu0 %v4276_v6  ;;  %v1893_v6 = vld [vmem:[#allocation9 + $0x368] sm:$0xff] }
 0x4dc   : > { %4278 = vmatprep.subr.bf16.mxu0 %v4887_v0  ;;  %v4309_v11 = vpack.c.bf16 %v1893_v6, %v1892_v60  ;;  %v4352_v60 = vpack.c.bf16 %v2534_v2, %v2530_v1  ;;  %v4384_v6 = vpack.c.bf16 %v2536_v49, %v2532_v31 }
 0x4dd   : > { %4256 = vmatpush3.bf16.msra.mxu1 %v4255_v10  ;;  %v1909_v10 = vld [vmem:[#allocation9 + $0x3e8] sm:$0xff] }
 0x4de   : > { %4257 = vmatprep.subr.bf16.mxu1 %v4887_v0  ;;  %v4333_v15 = vpack.c.bf16 %v1909_v10, %v1908_v8  ;;  %v2538_v8 = vld [vmem:[#allocation13 + $0x100] sm:$0xff] }
 0x4df   : > { %4280 = vmatpush3.bf16.msra.mxu0 %v4279_v13  ;;  %v1895_v13 = vld [vmem:[#allocation9 + $0x378] sm:$0xff]  ;;  %v2542_v10 = vld [vmem:[#allocation13 + $0x120] sm:$0xff] }
 0x4e0   : > { %4281 = vmatprep.subr.bf16.mxu0 %v4887_v0  ;;  %v4312_v20 = vpack.c.bf16 %v1895_v13, %v1894_v12  ;;  %v2544_v13 = vld [vmem:[#allocation13 + $0x130] sm:$0xff] }
 0x4e1   : > { %4259 = vmatpush3.bf16.msra.mxu1 %v4258_v19  ;;  %v1911_v19 = vld [vmem:[#allocation9 + $0x3f8] sm:$0xff] }
 0x4e2   : > { %4260 = vmatprep.subr.bf16.mxu1 %v4887_v0  ;;  %v4336_v21 = vpack.c.bf16 %v1911_v19, %v1910_v16  ;;  %v2551_v16 = vld [vmem:[#allocation13 + $0x168] sm:$0xff]  ;;  %v2549_v19 = vld [vmem:[#allocation13 + $0x158] sm:$0xff] }
 0x4e3   : > { %4283 = vmatpush3.bf16.msra.mxu0 %v4282_v23  ;;  %v2507_v23 = vld [vmem:[#allocation13 + $0x8] sm:$0xff] }
 0x4e4   : > { %4284 = vmatprep.subr.bf16.mxu0 %v4887_v0 }
 0x4e5   : > { %4262 = vmatpush3.bf16.msra.mxu1 %v4261_v28  ;;  %v4338_v28 = vpack.c.bf16 %v2511_v24, %v2507_v23 }
 0x4e6   : > { %4263 = vmatprep.subr.bf16.mxu1 %v4887_v0 }
 0x4e7   : > { %4286 = vmatpush3.bf16.msra.mxu0 %v4285_v34  ;;  %v2510_v34 = vld [vmem:[#allocation13 + $0x20] sm:$0xff] }
 0x4e8   : > { %4287 = vmatprep.subr.bf16.mxu0 %v4887_v0  ;;  %v4340_v37 = vpack.c.bf16 %v2510_v34, %v2506_v33  ;;  %v2548_v33 = vld [vmem:[#allocation13 + $0x150] sm:$0xff] }
 0x4e9   : > { %4265 = vmatpush3.bf16.msra.mxu1 %v4264_v38  ;;  %v2512_v38 = vld [vmem:[#allocation13 + $0x30] sm:$0xff] }
 0x4ea   : > { %4290 = vmatprep.subr.bf16.mxu1 %v4887_v0  ;;  %v2552_v34 = vld [vmem:[#allocation13 + $0x170] sm:$0xff] }
 0x4eb   : > { %4289 = vmatpush3.bf16.msra.mxu0 %v4288_v41  ;;  %v2517_v41 = vld [vmem:[#allocation13 + $0x58] sm:$0xff] }
 0x4ec   : > { %3751 = vmatmul.mubr.f32.vlgmr.msra.gmra.mrb[14].mxu1 %v5447_v52  ;;  %4314 = vmatprep.subr.bf16.mxu0 %v4887_v0  ;;  %v1900_v52 = vld [vmem:[#allocation9 + $0x3a0] sm:$0xff] }
 0x4ed   : > { %4292 = vmatpush3.bf16.msra.mxu1 %v4291_v32  ;;  %3820 = vmatprep.mubr.msk.f32.mxu1 %vm4888_vm0, %v4886_v9  ;;  %v2518_v32 = vld [vmem:[#allocation13 + $0x60] sm:$0xff] }
 0x4ee   : > { %3786 = vmatmul.mubr.f32.vlgmr.msra.gmra.mrb[16].mxu0 %v5452_v47  ;;  %4293 = vmatprep.subr.bf16.mxu1 %v4887_v0  ;;  %v4321_v47 = vpack.c.bf16 %v1901_v29, %v1900_v52  ;;  %v4344_v46 = vpack.c.bf16 %v2518_v32, %v2514_v43  ;;  %v2522_v52 = vld [vmem:[#allocation13 + $0x80] sm:$0xff]  ;;  %v2556_v43 = vld [vmem:[#allocation13 + $0x190] sm:$0xff] }
 0x4ef   : > { %4316 = vmatpush3.bf16.msra.mxu0 %v4315_v48  ;;  %3855 = vmatprep.mubr.msk.f32.mxu0 %vm4888_vm0, %v4886_v9  ;;  %v2520_v48 = vld [vmem:[#allocation13 + $0x70] sm:$0xff] }
 0x4f0   : > { %4317 = vmatprep.subr.bf16.mxu0 %v4887_v0  ;;  %v2560_v32 = vld [vmem:[#allocation13 + $0x1b0] sm:$0xff] }
 0x4f1   : > { %4295 = vmatpush3.bf16.msra.mxu1 %v4294_v17  ;;  %v4376_v17 = vpack.c.bf16 %v2520_v48, %v2516_v45  ;;  %v4396_v45 = vpack.c.bf16 %v2560_v32, %v2556_v43  ;;  %v2567_v48 = vld [vmem:[#allocation13 + $0x1e8] sm:$0xff] }
 0x4f2   : > { %4296 = vmatprep.subr.bf16.mxu1 %v4887_v0 }
 0x4f3   : > { %4319 = vmatpush3.bf16.msra.mxu0 %v4318_v53  ;;  %v2529_v53 = vld [vmem:[#allocation13 + $0xb8] sm:$0xff] }
 0x4f4   : > { %4320 = vmatprep.subr.bf16.mxu0 %v4887_v0  ;;  %v4378_v29 = vpack.c.bf16 %v2529_v53, %v2525_v50  ;;  %v2566_v50 = vld [vmem:[#allocation13 + $0x1e0] sm:$0xff] }
 0x4f5   : > { %4298 = vmatpush3.bf16.msra.mxu1 %v4297_v55  ;;  %v2526_v55 = vld [vmem:[#allocation13 + $0xa0] sm:$0xff] }
 0x4f6   : > { %4299 = vmatprep.subr.bf16.mxu1 %v4887_v0 }
 0x4f7   : > { %4322 = vmatpush3.bf16.msra.mxu0 %v4321_v47  ;;  %v4348_v47 = vpack.c.bf16 %v2526_v55, %v2522_v52  ;;  %v2568_v55 = vld [vmem:[#allocation13 + $0x1f0] sm:$0xff] }
 0x4f8   : > { %4323 = vmatprep.subr.bf16.mxu0 %v4887_v0 }
 0x4f9   : > { %4301 = vmatpush3.bf16.msra.mxu1 %v4300_v61  ;;  %v2533_v61 = vld [vmem:[#allocation13 + $0xd8] sm:$0xff] }
 0x4fa   : > { %4302 = vmatprep.subr.bf16.mxu1 %v4887_v0 }
 0x4fb   : > { %4325 = vmatpush3.bf16.msra.mxu0 %v4324_v22  ;;  %v2537_v22 = vld [vmem:[#allocation13 + $0xf8] sm:$0xff] }
 0x4fc   : > { %4326 = vmatprep.subr.bf16.mxu0 %v4887_v0 }
 0x4fd   : > { %4304 = vmatpush3.bf16.msra.mxu1 %v4303_v57  ;;  %v4382_v57 = vpack.c.bf16 %v2537_v22, %v2533_v61 }
 0x4fe   : > { %4305 = vmatprep.subr.bf16.mxu1 %v4887_v0 }
 0x4ff   : > { %4328 = vmatpush3.bf16.msra.mxu0 %v4327_v3  ;;  %v2539_v3 = vld [vmem:[#allocation13 + $0x108] sm:$0xff] }
 0x500   : > { %4329 = vmatprep.subr.bf16.mxu0 %v4887_v0 }
 0x501   : > { %4307 = vmatpush3.bf16.msra.mxu1 %v4306_v36  ;;  %v2545_v36 = vld [vmem:[#allocation13 + $0x138] sm:$0xff] }
 0x502   : > { %4308 = vmatprep.subr.bf16.mxu1 %v4887_v0  ;;  %v4386_v12 = vpack.c.bf16 %v2545_v36, %v2541_v5 }
 0x503   : > { %4331 = vmatpush3.bf16.msra.mxu0 %v4330_v7  ;;  %v4354_v7 = vpack.c.bf16 %v2543_v4, %v2539_v3  ;;  %v3013_v4 = vld [vmem:[%s5675_s25] ss:$0 sm:$0xff]  ;;  %s4752_s25 = scalar_lea.vmem %s4751_s28, 256 }
 0x504   : > { %4332 = vmatprep.subr.bf16.mxu0 %v4887_v0  ;;  %p4754_p8 = scmp.lt.s32.totalorder %s4752_s25, %s4746_s14 }
 0x505   : > { %4310 = vmatpush3.bf16.msra.mxu1 %v4309_v11  ;;  %v2540_v11 = vld [vmem:[#allocation13 + $0x110] sm:$0xff] }
 0x506   : > { %4311 = vmatprep.subr.bf16.mxu1 %v4887_v0  ;;  %v4388_v23 = vpack.c.bf16 %v2544_v13, %v2540_v11  ;;  %p4755_p7 = por %p4754_p8, %p4753_p4 }
 0x507   : > { %4334 = vmatpush3.bf16.msra.mxu0 %v4333_v15  ;;  %v2547_v15 = vld [vmem:[#allocation13 + $0x148] sm:$0xff] }
 0x508   : > { %4335 = vmatprep.subr.bf16.mxu0 %v4887_v0  ;;  %v2508_v0 = vld [vmem:[#allocation13 + $0x10] sm:$0xff]  ;;  %v4358_v24 = vpack.c.bf16 %v2551_v16, %v2547_v15  ;;  %p4756_p3 = pnand %p4755_p7, %p4749_p2 }
 0x509   : > { %4313 = vmatpush3.bf16.msra.mxu1 %v4312_v20  ;;  %v2553_v20 = vld [vmem:[#allocation13 + $0x178] sm:$0xff] }
 0x50a   : > { %4339 = vmatprep.subr.bf16.mxu1 %v4338_v28  ;;  %v2550_v28 = vld [vmem:[#allocation13 + $0x160] sm:$0xff]  ;;  %v4390_v30 = vpack.c.bf16 %v2553_v20, %v2549_v19 }
 0x50b   : > { %4337 = vmatpush3.bf16.msra.mxu0 %v4336_v21  ;;  %v4356_v21 = vpack.c.bf16 %v2542_v10, %v2538_v8 }
 0x50c   : > { %3821 = vmatmul.mubr.f32.vlgmr.msra.gmra.mrb[16].mxu1 %v5457_v58  ;;  %v4372_v58 = vpack.c.bf16 %v2512_v38, %v2508_v0  ;;  %4371 = vmatprep.subr.bf16.mxu0 %v4370_v35  ;;  %v4360_v35 = vpack.c.bf16 %v2550_v28, %v2546_v27  ;;  %v2555_v0 = vld [vmem:[#allocation13 + $0x188] sm:$0xff] }
 0x50d   : > { %2634 = vmatprep.mubr.f32.mxu1 %v4886_v9  ;;  %4341 = vmatpush1.bf16.msra.mxu1 %v4340_v37  ;;  %v4392_v37 = vpack.c.bf16 %v2552_v34, %v2548_v33  ;;  %v2559_v38 = vld [vmem:[#allocation13 + $0x1a8] sm:$0xff] }
 0x50e   : > { %3856 = vmatmul.mubr.f32.vlgmr.msra.gmra.mrb[18].mxu0 %v5463_v63  ;;  %v4374_v63 = vpack.c.bf16 %v2521_v42, %v2517_v41  ;;  %v2554_v41 = vld [vmem:[#allocation13 + $0x180] sm:$0xff] }
 0x50f   : > { %2705 = vmatprep.mubr.f32.mxu0 %v4886_v9  ;;  %v4342_v9 = vpack.c.bf16 %v2519_v40, %v2515_v39  ;;  %4373 = vmatpush1.bf16.msra.mxu0 %v4372_v58  ;;  %v2557_v39 = vld [vmem:[#allocation13 + $0x198] sm:$0xff]  ;;  %v4362_v58 = vpack.c.bf16 %v2559_v38, %v2555_v0  ;;  %v2558_v42 = vld [vmem:[#allocation13 + $0x1a0] sm:$0xff] }
 0x510   : > { %4375 = vmatprep.subr.bf16.mxu0 %v4374_v63  ;;  %v2561_v40 = vld [vmem:[#allocation13 + $0x1b8] sm:$0xff]  ;;  %v4364_v63 = vpack.c.bf16 %v2558_v42, %v2554_v41 }
 0x511   : > { %4343 = vmatprep.subr.bf16.mxu1 %v4342_v9  ;;  %v4394_v9 = vpack.c.bf16 %v2561_v40, %v2557_v39 }
 0x512   : > { %4345 = vmatpush1.bf16.msra.mxu1 %v4344_v46  ;;  %v2563_v46 = vld [vmem:[#allocation13 + $0x1c8] sm:$0xff] }
 0x513   : > { %4377 = vmatpush1.bf16.msra.mxu0 %v4376_v17  ;;  %4347 = vmatprep.subr.bf16.mxu1 %v4346_v25  ;;  %v4366_v14 = vpack.c.bf16 %v2567_v48, %v2563_v46  ;;  %v2569_v17 = vld [vmem:[#allocation13 + $0x1f8] sm:$0xff]  ;;  %v2562_v25 = vld [vmem:[#allocation13 + $0x1c0] sm:$0xff] }
 0x514   : > { %4379 = vmatprep.subr.bf16.mxu0 %v4378_v29  ;;  %v4398_v53 = vpack.c.bf16 %v2569_v17, %v2565_v26  ;;  %v4368_v52 = vpack.c.bf16 %v2566_v50, %v2562_v25  ;;  %v2564_v29 = vld [vmem:[#allocation13 + $0x1d0] sm:$0xff] }
 0x515   : > { %v4400_v44 = vpack.c.bf16 %v2568_v55, %v2564_v29 }
 0x516   : > { %4349 = vmatpush1.bf16.msra.mxu1 %v4348_v47 }
 0x517   : > { %4381 = vmatpush1.bf16.msra.mxu0 %v4380_v62  ;;  %4351 = vmatprep.subr.bf16.mxu1 %v4350_v54 }
 0x518   : > { %4383 = vmatprep.subr.bf16.mxu0 %v4382_v57 }
 0x51a   : > { %4353 = vmatpush1.bf16.msra.mxu1 %v4352_v60 }
 0x51b   : > { %4385 = vmatpush1.bf16.msra.mxu0 %v4384_v6  ;;  %4355 = vmatprep.subr.bf16.mxu1 %v4354_v7  ;;  %v883_v6 = vadd.f32 %v3013_v4, %v5265_v18 }
 0x51c   : > { %4387 = vmatprep.subr.bf16.mxu0 %v4386_v12 }
 0x51d   : > { %v3015_v13 = vmul.f32 -1.442695, %v883_v6 }
 0x51e   : > { %4357 = vmatpush1.bf16.msra.mxu1 %v4356_v21 }
 0x51f   : > { %4389 = vmatpush1.bf16.msra.mxu0 %v4388_v23  ;;  %4359 = vmatprep.subr.bf16.mxu1 %v4358_v24  ;;  %4556 = vpow2.f32 %v3015_v13 }
 0x520   : > { %4391 = vmatprep.subr.bf16.mxu0 %v4390_v30 }
 0x522   : > { %4361 = vmatpush1.bf16.msra.mxu1 %v4360_v35 }
 0x523   : > { %4393 = vmatpush1.bf16.msra.mxu0 %v4392_v37  ;;  %4363 = vmatprep.subr.bf16.mxu1 %v4362_v58 }
 0x524   : > { %4395 = vmatprep.subr.bf16.mxu0 %v4394_v9 }
 0x526   : > { %4365 = vmatpush1.bf16.msra.mxu1 %v4364_v63 }
 0x527   : > { %4397 = vmatpush1.bf16.msra.mxu0 %v4396_v45  ;;  %4367 = vmatprep.subr.bf16.mxu1 %v4366_v14 }
 0x528   : > { %4399 = vmatprep.subr.bf16.mxu0 %v4398_v53 }
 0x529   : > { %v4557_v15 = vpop.eup %4556 }
 0x52a   : > { %4369 = vmatpush1.bf16.msra.mxu1 %v4368_v52  ;;  %v2475_v16 = vadd.f32 1.0, %v4557_v15 }
 0x52b   : > { %4401 = vmatpush1.bf16.msra.mxu0 %v4400_v44 }
 0x52c   : > { %4558 = vrcp.f32 %v2475_v16 }
 0x536   : > { %v4559_v28 = vpop.eup %4558 }
 0x57f   : > { %v1978_v56 = vpop.f32.mrb[10].mxu1 }
 0x580   : > { %v3612_v47 = vpop.f32.mrb[11].mxu1 }
 0x581   : > { %v2048_v51 = vpop.f32.mrb[12].mxu0 }
 0x582   : > { %v2486_v59 = vrot.slane %v2048_v51, 7  ;;  %v3647_v61 = vpop.f32.mrb[13].mxu0 }
 0x584   : > { %v2487_v62 = vsel %vm1670_vm1, %v2486_v59, %v1978_v56 }
 0x59f   : > { %v2118_v54 = vpop.f32.mrb[12].mxu1 }
 0x5a0   : > { %v2488_v22 = vrot.slane %v2118_v54, 6  ;;  %v3682_v1 = vpop.f32.mrb[13].mxu1 }
 0x5a1   : > { %v2188_v2 = vpop.f32.mrb[14].mxu0 }
 0x5a2   : > { %v2489_v57 = vsel %vm1673_vm2, %v2488_v22, %v2487_v62  ;;  %v2490_v31 = vrot.slane %v2188_v2, 5  ;;  %v3717_v49 = vpop.f32.mrb[15].mxu0 }
 0x5a4   : > { %v2491_v3 = vsel %vm1676_vm3, %v2490_v31, %v2489_v57 }
 0x5bf   : > { %v2258_v5 = vpop.f32.mrb[14].mxu1 }
 0x5c0   : > { %v2492_v36 = vrot.slane %v2258_v5, 4  ;;  %v3752_v60 = vpop.f32.mrb[15].mxu1 }
 0x5c1   : > { %v2328_v7 = vpop.f32.mrb[16].mxu0 }
 0x5c2   : > { %v2493_v8 = vsel %vm1679_vm4, %v2492_v36, %v2491_v3  ;;  %v2494_v10 = vrot.slane %v2328_v7, 3  ;;  %v3787_v11 = vpop.f32.mrb[17].mxu0 }
 0x5c4   : > { %v2495_v12 = vsel %vm1682_vm5, %v2494_v10, %v2493_v8 }
 0x5df   : > { %v2398_v19 = vpop.f32.mrb[16].mxu1 }
 0x5e0   : > { %v2496_v20 = vrot.slane %v2398_v19, 2  ;;  %v3822_v21 = vpop.f32.mrb[17].mxu1 }
 0x5e1   : > { %v2468_v18 = vpop.f32.mrb[18].mxu0 }
 0x5e2   : > { %v2497_v23 = vsel %vm1685_vm6, %v2496_v20, %v2495_v12  ;;  %v2498_v24 = vrot.slane %v2468_v18, 1  ;;  %v3857_v27 = vpop.f32.mrb[19].mxu0 }
 0x5e4   : > { %v2499_v30 = vsel %vm1688_vm7, %v2498_v24, %v2497_v23 }
 0x5e5   : > { %v2501_v33 = vmul.f32 %v4559_v28, %v2499_v30 }
 0x5e7   : > { %2635 = vmatmul.mubr.f32.vlgmr.msra.gmra.mrb[0].mxu1 %v2501_v33  ;;  %2706 = vmatmul.mubr.f32.vlgmr.msra.gmra.mrb[2].mxu0 %v2501_v33 }
 0x5e8   : > { %4759 = shalt.err (!%p4756_p3)
}
 0x5e9   : > { %s4760_s30 = scalar_lea.hbm %s5553_s13, 128  ;;  %s4764_s10 = scalar_lea.hbm %s5676_s29, 896 }
 0x5ea   : > { %p4761_p12 = scmp.ne.s32.totalorder %s5553_s13, %s4760_s30  ;;  %p4765_p11 = scmp.lt.u32.totalorder %s5553_s13, %s5676_s29 }
 0x5eb   : > { %p4766_p6 = scmp.lt.u32.totalorder %s4764_s10, %s4760_s30  ;;  %p4768_p9 = scmp.lt.u32.totalorder %s4760_s30, %s5553_s13 }
 0x5ec   : > { %p4762_p13 = pnand %p4761_p12, %p5677_p10 }
 0x5ed   : > { %p4767_p5 = por %p4766_p6, %p4765_p11 }
 0x5ee   : > { %p4763_p0 = pneg %p4762_p13 }
 0x5ef   : > { %p4769_p1 = por %p4768_p9, %p4767_p5 }
 0x5f1   : > { %p4770_p2 = pnand %p4769_p1, %p4763_p0 }
 0x5f3   : > { %4773 = shalt.err (!%p4770_p2)
}
 0x5f4   : > { %4433 = dma.vmem_to_hbm [thread:$0]  (%p5677_p10), %s2806_s6, 128, %s5553_s13, %s2777_s9   ;;  %v2502_v34 = vld [vmem:[%s5205_s15] sm:$0xff]  ;;  %v2503_v35 = vld [vmem:[%s5205_s15 + $0x8] sm:$0xff]  ;;  %v2505_v9 = vld [vmem:[%s5205_s15 + $0x18] sm:$0xff] }
 0x5f5   : > { %v2504_v43 = vld [vmem:[%s5205_s15 + $0x10] sm:$0xff]  ;;  %v558_v50 = vld [vmem:[#allocation3] sm:$0xff]  ;;  %s2791_s15 = sshll.u32 %s5224_s11, 4  ;;  %s5678_s26 = sshll.u32 %s4864_s20, 7  ;;  %s5586_s15 = int_to_ptr.vmem [resolvable:$true] %s2791_s15 }
 0x5f6   : > { %s5679_s9 = sld [smem:[#allocation28_spill]]  ;;  %s2772_s25 = scalar_lea.sflag [#allocation6], %s5201_s1 }
 0x5f7   : > { %s4774_s30 = scalar_lea.vmem %s5586_s15, 128  ;;  %s4891_s16 = smov [#allocation15]  }
 0x5f8   : > { %p4775_p4 = scmp.ne.s32.totalorder %s5586_s15, %s4774_s30  ;;  %s4778_s20 = sshll.u32 %s4891_s16, 4  ;;  %s4779_s20 = int_to_ptr.vmem [resolvable:$false] %s4778_s20 }
 0x5f9   : > { %s4780_s24 = scalar_lea.vmem %s4779_s20, 256  ;;  %p4781_p3 = scmp.lt.s32.totalorder %s5586_s15, %s4779_s20 }
 0x5fa   : > { %p4776_p8 = pnand %p4775_p4, %p5677_p10  ;;  %p4782_p12 = scmp.lt.s32.totalorder %s4780_s24, %s4774_s30 }
 0x5fc   : > { %s5584_s14 = scalar_lea.hbm %s5679_s9, %s5678_s26  ;;  %p4777_p7 = pneg %p4776_p8 }
 0x5fd   : > { %p4783_p13 = por %p4782_p12, %p4781_p3 }
 0x5ff   : > { %p4784_p0 = pnand %p4783_p13, %p4777_p7 }
 0x6ba   : > { %v2636_v37 = vpop.f32.mrb[0].mxu1  ;;  %v2707_v0 = vpop.f32.mrb[2].mxu0 }
 0x6bb   : > { %v2712_v38 = vadd.f32 %v2636_v37, %v2502_v34  ;;  %v2638_v39 = vpop.f32.mrb[1].mxu1  ;;  %v2709_v58 = vpop.f32.mrb[3].mxu0  ;;  %v2714_v45 = vadd.f32 %v2707_v0, %v2504_v43 }
 0x6bc   : > { %v2713_v40 = vadd.f32 %v2638_v39, %v2503_v35  ;;  %v2715_v63 = vadd.f32 %v2709_v58, %v2505_v9 }
 0x6bd   : > { %v3016_v41 = vmul.f32 -1.442695, %v2712_v38 }
 0x6be   : > { %v3017_v42 = vmul.f32 -1.442695, %v2713_v40  ;;  %v3018_v32 = vmul.f32 -1.442695, %v2715_v63 }
 0x6bf   : > { %4560 = vpow2.f32 %v3016_v41 }
 0x6c0   : > { %4562 = vpow2.f32 %v3017_v42 }
 0x6c1   : > { %4564 = vpow2.f32 %v3018_v32 }
 0x6c2   : > { %4566 = vtanh.f32 %v2714_v45 }
 0x6c9   : > { %v4561_v46 = vpop.eup %4560 }
 0x6ca   : > { %v4563_v48 = vpop.eup %4562  ;;  %v2723_v26 = vadd.f32 1.0, %v4561_v46 }
 0x6cb   : > { %v2729_v14 = vadd.f32 1.0, %v4563_v48  ;;  %v4565_v17 = vpop.eup %4564 }
 0x6cc   : > { %4568 = vrcp.f32 %v2723_v26  ;;  %v4567_v25 = vpop.eup %4566  ;;  %v2736_v55 = vadd.f32 1.0, %v4565_v17 }
 0x6cd   : > { %4570 = vrcp.f32 %v2729_v14 }
 0x6ce   : > { %4572 = vrcp.f32 %v2736_v55 }
 0x6d6   : > { %v4569_v53 = vpop.eup %4568 }
 0x6d7   : > { %v4571_v52 = vpop.eup %4570  ;;  %v2740_v29 = vmul.f32 %v4569_v53, %v4567_v25 }
 0x6d8   : > { %v2739_v44 = vmul.f32 %v4571_v52, %v558_v50  ;;  %v4573_v47 = vpop.eup %4572 }
 0x6da   : > { %v2741_v56 = vadd.f32 %v2740_v29, %v2739_v44 }
 0x6dc   : > { %2745 = vst [vmem:[#allocation3] sm:$0xff] %v2741_v56  ;;  %4574 = vtanh.f32 %v2741_v56 }
 0x6e6   : > { %v4575_v51 = vpop.eup %4574 }
 0x6e7   : > { %v2743_v59 = vmul.f32 %v4575_v51, %v4573_v47 }
 0x6e9   : > { %2744 = vst [vmem:[#allocation2] sm:$0xff] %v2743_v59  ;;  %2746 = vst [vmem:[%s5224_s11] sm:$0xff] %v2743_v59 }
 0x6ea   : > { %4787 = shalt.err (!%p4784_p0)
}
 0x6eb   : > { %s4788_s1 = scalar_lea.hbm %s5584_s14, 128  ;;  %s4792_s28 = scalar_lea.hbm %s5679_s9, 896 }
 0x6ec   : > { %p4789_p11 = scmp.ne.s32.totalorder %s5584_s14, %s4788_s1  ;;  %p4793_p9 = scmp.lt.u32.totalorder %s5584_s14, %s5679_s9 }
 0x6ed   : > { %p4794_p1 = scmp.lt.u32.totalorder %s4792_s28, %s4788_s1  ;;  %p4796_p4 = scmp.lt.u32.totalorder %s4788_s1, %s5584_s14 }
 0x6ee   : > { %p4790_p6 = pnand %p4789_p11, %p5677_p10 }
 0x6ef   : > { %p4795_p2 = por %p4794_p1, %p4793_p9 }
 0x6f0   : > { %p4791_p5 = pneg %p4790_p6 }
 0x6f1   : > { %p4797_p8 = por %p4796_p4, %p4795_p2 }
 0x6f3   : > { %p4798_p7 = pnand %p4797_p8, %p4791_p5 }
 0x6f5   : > { %4801 = shalt.err (!%p4798_p7)
}
 0x6f6   : > { %4432 = dma.vmem_to_hbm [thread:$0]  (%p5677_p10), %s5586_s15, 128, %s5584_s14, %s2772_s25  }
 0x6f7 PF: > { %p4474_p3 = scmp.ge.s32.totalorder %s4872_s22, 2  ;;  %s2817_s6 = sand.u32 1, %s4852_s17  }
 0x6f8   : > { %p5680_p12 = scmp.ne.s32.totalorder %s5669_s27, 0  ;;  %s2818_s30 = scalar_lea.sflag [#allocation6], %s2817_s6 }
 0x6fa   : > { %p4457_p13 = pnand %p4474_p3, %p5680_p12 }
 0x6fc   : > { %4843 = dma.done.wait (!%p4457_p13), %s2818_s30, 128  }
 0x6fd   : > { %4845 = vsyncadd (!%p4457_p13), %s2818_s30, 4294967168  ;;  %s2827_s16 = scalar_lea.sflag [#allocation17], %s2817_s6 }
 0x6fe   : > { %4847 = dma.done.wait (!%p4457_p13), %s2827_s16, 128  }
 0x6ff   : > { %4849 = vsyncadd (!%p4457_p13), %s2827_s16, 4294967168  ;;  %s34_s22 = sadd.s32 1, %s4872_s22   ;;  %s5681_s17 = smov %s4856_s18 }
 0x700   : > { %p31_p0 = scmp.ge.s32.totalorder %s34_s22, 9   ;;  %s5682_s18 = smov %s4860_s19 }
 0x701   : > { %s5683_s19 = smov %s5152_s23  ;;  %s5684_s20 = smov %s4868_s21 }
 0x702   : > { %s5685_s21 = smov %s5687_s7  ;;  %33 = sbr.rel (!%p31_p0) target bundleno = 18 (0x12), region = 152 }
 0x709   :  { %2832 = vsyncpa [#allocation5], 1 }
 0x70a   :  { %2834 = vsyncpa [#allocation5 + $0x1], 1 }
 0x70b   :  { %2835 = vsyncpa [#allocation8], 1 }
 0x70c   :  { %2836 = vsyncpa [#allocation11], 1 }
 0x70d   :  { %2837 = vsyncpa [#allocation14], 1 }
 0x70e   :  { %2838 = vsyncpa [#allocation6], 1 }
 0x70f   :  { %2840 = vsyncpa [#allocation6 + $0x1], 1 }
 0x710   :  { %2841 = vsyncpa [#allocation17], 1 }
 0x711   :  { %2843 = vsyncpa [#allocation17 + $0x1], 1 }

</bundles_post_ra>
